<compile_context>
chip_gen: v7x
topology: tpu7x:2x2x1
jax: 0.10.0
libtpu: 0.0.40
codegen_flags: <defaults>
</compile_context>

<pallas_src>
import math
from functools import partial

import jax
import jax.numpy as jnp
import numpy as np
from jax.experimental import pallas as pl
from jax.experimental.pallas import tpu as pltpu


# ----------------------------------------------------------------------------
# Fused Pallas kernel: interaction-detector MLP + crossing projection per pair
# ----------------------------------------------------------------------------
def _autofi_pair_kernel(emb_ref, w1a_ref, w1b_ref, b1_ref, w2_ref, b2_ref,
                        w3blk_ref, wpblk_ref, scores_ref, cross_ref, *, pairs):
    """One batch tile (batch in the lane dimension).

    emb_ref   : (F, D, TB)      bf16  field embeddings
    w1a / w1b : (H1, D)         bf16  split first MLP layer (W1[:, :D] / [:, D:])
    b1        : (H1, 1)         f32
    w2        : (H2, H1)        bf16
    b2        : (H2, 1)         f32
    w3blk     : (P, P*H2)       f32   block-diag repeat of w3 (last MLP layer)
    wpblk     : (P, P*D)        f32   block-diag repeat of crossing projection
    scores    : (P, TB)         f32   raw MLP scores (layer-3 bias added outside)
    cross     : (P, TB)         f32   (e_i * e_j) . wp per pair (bias outside)
    """
    num_fields = emb_ref.shape[0]
    emb_bf = emb_ref[...]                                   # (F, D, TB) bf16
    emb_f32 = emb_bf.astype(jnp.float32)
    w1a = w1a_ref[...]
    w1b = w1b_ref[...]
    b1 = b1_ref[...]
    w2 = w2_ref[...]
    b2 = b2_ref[...]

    # Split-W1 trick: per-field partial layer-1 projections (2*F matmuls).
    part_a = [jnp.dot(w1a, emb_bf[f], preferred_element_type=jnp.float32)
              for f in range(num_fields)]                   # each (H1, TB) f32
    part_b = [jnp.dot(w1b, emb_bf[f], preferred_element_type=jnp.float32)
              for f in range(num_fields)]

    h2_list, cross_list = [], []
    for (i, j) in pairs:                                    # static unroll
        h1 = jnp.maximum(part_a[i] + part_b[j] + b1, 0.0)   # (H1, TB) f32
        h2 = jnp.dot(w2, h1.astype(jnp.bfloat16),
                     preferred_element_type=jnp.float32) + b2
        h2 = jnp.maximum(h2, 0.0)                           # (H2, TB) f32
        h2_list.append(h2)
        cross_list.append(emb_f32[i] * emb_f32[j])          # (D, TB) f32

    # Aligned sublane concatenation (H2 and D are multiples of 8), then one
    # block-diagonal matmul each -> lane-dense (P, TB) outputs in one store.
    h2_all = jnp.concatenate(h2_list, axis=0)               # (P*H2, TB)
    e_all = jnp.concatenate(cross_list, axis=0)             # (P*D, TB)
    scores_ref[...] = jnp.dot(w3blk_ref[...], h2_all,
                              preferred_element_type=jnp.float32)
    cross_ref[...] = jnp.dot(wpblk_ref[...], e_all,
                             preferred_element_type=jnp.float32)


def _pair_scores_and_cross(emb_bf, w1a, w1b, b1c, w2, b2c, w3blk, wpblk,
                           pairs, tb):
    num_fields, emb_dim, b_padded = emb_bf.shape
    h1 = w1a.shape[0]
    h2 = w2.shape[0]
    num_pairs = len(pairs)
    num_tiles = b_padded // tb

    def wspec(shape):
        return pl.BlockSpec(shape, lambda b: (0, 0))

    flops = b_padded * (4 * num_fields * h1 * emb_dim       # layer-1 partials
                        + 2 * num_pairs * h1 * h2           # layer 2
                        + 2 * num_pairs * num_pairs * h2    # layer 3 (blockdiag)
                        + num_pairs * emb_dim               # e_i * e_j
                        + 2 * num_pairs * num_pairs * emb_dim)  # cross proj
    bytes_accessed = (num_fields * emb_dim * b_padded * 2               # emb
                      + (2 * h1 * emb_dim + h2 * h1) * 2                # bf16 W
                      + (h1 + h2) * 4
                      + num_pairs * num_pairs * (h2 + emb_dim) * 4      # blkdiag
                      + 2 * num_pairs * b_padded * 4)                   # outputs

    return pl.pallas_call(
        partial(_autofi_pair_kernel, pairs=tuple(pairs)),
        out_shape=(jax.ShapeDtypeStruct((num_pairs, b_padded), jnp.float32),
                   jax.ShapeDtypeStruct((num_pairs, b_padded), jnp.float32)),
        grid=(num_tiles,),
        in_specs=[
            pl.BlockSpec((num_fields, emb_dim, tb), lambda b: (0, 0, b)),
            wspec((h1, emb_dim)), wspec((h1, emb_dim)), wspec((h1, 1)),
            wspec((h2, h1)), wspec((h2, 1)),
            wspec((num_pairs, num_pairs * h2)),
            wspec((num_pairs, num_pairs * emb_dim)),
        ],
        out_specs=(pl.BlockSpec((num_pairs, tb), lambda b: (0, b)),
                   pl.BlockSpec((num_pairs, tb), lambda b: (0, b))),
        compiler_params=pltpu.CompilerParams(
            dimension_semantics=("parallel",)),
        cost_estimate=pl.CostEstimate(flops=flops, transcendentals=0,
                                      bytes_accessed=bytes_accessed),
    )(emb_bf, w1a, w1b, b1c, w2, b2c, w3blk, wpblk)


# ----------------------------------------------------------------------------
# Parameter construction (mirrors the PyTorch module; weights in (out, in))
# ----------------------------------------------------------------------------
def _xavier(key, shape, fan_in, fan_out):
    bound = math.sqrt(6.0 / (fan_in + fan_out))
    return jax.random.uniform(key, shape, jnp.float32, -bound, bound)


def init_autofi_params(key, field_dims, embedding_dim, hidden_dims):
    total = int(sum(field_dims))
    num_fields = len(field_dims)
    d = embedding_dim
    h1, h2 = hidden_dims
    keys = jax.random.split(key, num_fields + 6)
    p = {}
    # FeaturesLinear: nn.Embedding(total, 1) + bias(1)
    p["lin_fc"] = _xavier(keys[0], (total, 1), total, 1)
    p["lin_bias"] = jnp.zeros((), jnp.float32)
    # FeaturesEmbedding: one table per field, stored transposed (D, total)
    # (== nn.Embedding.weight.T; kernel-friendly layout for (D, B) gathers).
    p["emb_tables_t"] = [
        _xavier(keys[1 + f], (d, total), total, d) for f in range(num_fields)]
    # FeatureInteractionDetector MLP, torch Linear (out, in) layout.
    p["w1"] = _xavier(keys[num_fields + 1], (h1, 2 * d), 2 * d, h1)
    p["b1"] = jnp.zeros((h1,), jnp.float32)
    p["w2"] = _xavier(keys[num_fields + 2], (h2, h1), h1, h2)
    p["b2"] = jnp.zeros((h2,), jnp.float32)
    p["w3"] = _xavier(keys[num_fields + 3], (1, h2), h2, 1)
    p["b3"] = jnp.zeros((), jnp.float32)
    # FeatureCrossing projection: Linear(D, 1)
    p["wp"] = _xavier(keys[num_fields + 4], (1, d), d, 1)
    p["wp_b"] = jnp.zeros((), jnp.float32)
    # global bias
    p["bias"] = jnp.zeros((), jnp.float32)
    return p


# ----------------------------------------------------------------------------
# Forward pass: fused Pallas kernel + tiny XLA epilogue (top-k is data dep.)
# ----------------------------------------------------------------------------
def autofi_forward(params, x, field_dims, embedding_dim, hidden_dims,
                   num_interactions):
    num_fields = len(field_dims)
    d = embedding_dim
    # TODO(synk): generalize the kernel to arbitrary hidden_dims depth.
    assert len(hidden_dims) == 2, "kernel is specialized for 2 hidden layers"
    h1, h2 = hidden_dims
    batch = x.shape[0]

    offsets = jnp.asarray(
        np.array((0, *np.cumsum(field_dims)[:-1]), dtype=np.int32))
    x_off = x + offsets[None, :]                             # (B, F)

    pairs = [(i, j) for i in range(num_fields)
             for j in range(i + 1, num_fields)]
    num_pairs = len(pairs)

    # Batch tiling: lanes = batch. Tile must be a multiple of 128 or equal the
    # full (padded) batch; small single tile for small B, 512-wide tiles else.
    if batch <= 512:
        tb, b_padded = batch, batch
    else:
        tb = 512
        b_padded = -(-batch // tb) * tb
    x_pad = jnp.pad(x_off, ((0, b_padded - batch), (0, 0)))  # pad rows -> idx 0

    # Per-field embedding gather directly into (F, D, Bp); bf16 for the MXU.
    emb_fdb = jnp.stack(
        [jnp.take(params["emb_tables_t"][f], x_pad[:, f], axis=1)
         for f in range(num_fields)], axis=0)                # (F, D, Bp) f32
    emb_bf = emb_fdb.astype(jnp.bfloat16)

    # Kernel weight operands (torch (out, in) layout is already what we need).
    w1 = params["w1"].astype(jnp.bfloat16)                   # (H1, 2D)
    w1a, w1b = w1[:, :d], w1[:, d:]
    b1c = params["b1"].reshape(h1, 1)
    w2 = params["w2"].astype(jnp.bfloat16)                   # (H2, H1)
    b2c = params["b2"].reshape(h2, 1)
    eye_p = jnp.eye(num_pairs, dtype=jnp.float32)
    w3blk = jnp.kron(eye_p, params["w3"])                    # (P, P*H2)
    wpblk = jnp.kron(eye_p, params["wp"])                    # (P, P*D)

    scores_pb, cross_pb = _pair_scores_and_cross(
        emb_bf, w1a, w1b, b1c, w2, b2c, w3blk, wpblk, pairs, tb)

    scores_pb = scores_pb[:, :batch] + params["b3"]          # (P, B)
    cross_pb = cross_pb[:, :batch]                           # (P, B)

    # Top-k over batch-mean scores (data-dependent -> XLA glue).
    k = min(num_interactions, num_pairs)
    if k >= num_pairs:
        sel_s, sel_c = scores_pb, cross_pb
    else:
        _, topk = jax.lax.top_k(jnp.mean(scores_pb, axis=1), k)
        sel_s = jnp.take(scores_pb, topk, axis=0)            # (K, B)
        sel_c = jnp.take(cross_pb, topk, axis=0)

    crossed = jnp.sum(sel_s * sel_c, axis=0) + params["wp_b"]          # (B,)
    lin = jnp.sum(params["lin_fc"][x_off][..., 0], axis=1) + params["lin_bias"]
    return lin + crossed + params["bias"]                               # (B,)


# ----------------------------------------------------------------------------
# Pure-JAX reference (mirrors the bf16-MXU / f32-accumulate precision policy)
# ----------------------------------------------------------------------------
def autofi_reference(params, x, field_dims, embedding_dim, hidden_dims,
                     num_interactions):
    num_fields = len(field_dims)
    offsets = jnp.asarray(
        np.array((0, *np.cumsum(field_dims)[:-1]), dtype=np.int32))
    x_off = x + offsets[None, :]

    emb = jnp.stack(
        [jnp.take(params["emb_tables_t"][f], x_off[:, f], axis=1).T
         for f in range(num_fields)], axis=1)                # (B, F, D) f32
    emb_bf = emb.astype(jnp.bfloat16)
    emb_rt = emb_bf.astype(jnp.float32)                      # bf16-rounded emb

    w1 = params["w1"].astype(jnp.bfloat16)
    w2 = params["w2"].astype(jnp.bfloat16)
    pairs = [(i, j) for i in range(num_fields)
             for j in range(i + 1, num_fields)]
    num_pairs = len(pairs)

    scores, crosses = [], []
    for (i, j) in pairs:
        pe = jnp.concatenate([emb_bf[:, i, :], emb_bf[:, j, :]], axis=1)
        a1 = jnp.maximum(
            jnp.dot(pe, w1.T, preferred_element_type=jnp.float32)
            + params["b1"], 0.0)
        a2 = jnp.maximum(
            jnp.dot(a1.astype(jnp.bfloat16), w2.T,
                    preferred_element_type=jnp.float32) + params["b2"], 0.0)
        scores.append(a2 @ params["w3"][0] + params["b3"])                # (B,)
        crosses.append((emb_rt[:, i, :] * emb_rt[:, j, :]) @ params["wp"][0])
    scores = jnp.stack(scores, axis=1)                       # (B, P)
    crosses = jnp.stack(crosses, axis=1)                     # (B, P)

    k = min(num_interactions, num_pairs)
    if k >= num_pairs:
        sel_s, sel_c = scores, crosses
    else:
        _, topk = jax.lax.top_k(jnp.mean(scores, axis=0), k)
        sel_s = jnp.take(scores, topk, axis=1)
        sel_c = jnp.take(crosses, topk, axis=1)
    crossed = jnp.sum(sel_s * sel_c, axis=1) + params["wp_b"]
    lin = jnp.sum(params["lin_fc"][x_off][..., 0], axis=1) + params["lin_bias"]
    return lin + crossed + params["bias"]


# ----------------------------------------------------------------------------
if __name__ == "__main__":
    field_dims = [10, 8, 6, 5, 7, 9]     # 6 fields -> 15 pairs, top-k path used
    embedding_dim = 32
    hidden_dims = [64, 32]
    num_interactions = 10
    batch = 8

    key = jax.random.PRNGKey(0)
    pkey, xkey = jax.random.split(key)
    params = init_autofi_params(pkey, field_dims, embedding_dim, hidden_dims)

    cols = [jax.random.randint(jax.random.fold_in(xkey, i), (batch,), 0, fd,
                               jnp.int32)
            for i, fd in enumerate(field_dims)]
    x = jnp.stack(cols, axis=1)                              # (B, F)

    fwd = jax.jit(partial(autofi_forward,
                          field_dims=field_dims,
                          embedding_dim=embedding_dim,
                          hidden_dims=hidden_dims,
                          num_interactions=num_interactions))
    out = fwd(params, x)
    jax.block_until_ready(out)

    ref = autofi_reference(params, x, field_dims, embedding_dim, hidden_dims,
                           num_interactions)
    np.testing.assert_allclose(np.asarray(out), np.asarray(ref),
                               rtol=1e-2, atol=1e-2)
    assert out.shape == (batch,)
    print("KERNEL_OK")
</pallas_src>

<mosaic_0001>
module attributes {stable_mosaic.version = 11 : i64} {
  func.func @_autofi_pair_kernel(%arg0: i32, %arg1: memref<6x32x8xbf16, #tpu.memory_space<vmem>>, %arg2: memref<64x32xbf16, #tpu.memory_space<vmem>>, %arg3: memref<64x32xbf16, #tpu.memory_space<vmem>>, %arg4: memref<64x1xf32, #tpu.memory_space<vmem>>, %arg5: memref<32x64xbf16, #tpu.memory_space<vmem>>, %arg6: memref<32x1xf32, #tpu.memory_space<vmem>>, %arg7: memref<15x480xf32, #tpu.memory_space<vmem>>, %arg8: memref<15x480xf32, #tpu.memory_space<vmem>>, %arg9: memref<15x8xf32, #tpu.memory_space<vmem>>, %arg10: memref<15x8xf32, #tpu.memory_space<vmem>>) attributes {dimension_semantics = [#tpu.dimension_semantics<parallel>], iteration_bounds = array<i64: 1>, scalar_prefetch = 0 : i64, scratch_operands = 0 : i64, tpu.core_type = #tpu.core_type<tc>, window_params = [{transform_indices = @transform_0, window_bounds = array<i64: 6, 32, 8>}, {pipeline_mode = #tpu.pipeline_mode<synchronous>, transform_indices = @transform_1, window_bounds = array<i64: 64, 32>}, {pipeline_mode = #tpu.pipeline_mode<synchronous>, transform_indices = @transform_2, window_bounds = array<i64: 64, 32>}, {pipeline_mode = #tpu.pipeline_mode<synchronous>, transform_indices = @transform_3, window_bounds = array<i64: 64, 1>}, {pipeline_mode = #tpu.pipeline_mode<synchronous>, transform_indices = @transform_4, window_bounds = array<i64: 32, 64>}, {pipeline_mode = #tpu.pipeline_mode<synchronous>, transform_indices = @transform_5, window_bounds = array<i64: 32, 1>}, {pipeline_mode = #tpu.pipeline_mode<synchronous>, transform_indices = @transform_6, window_bounds = array<i64: 15, 480>}, {pipeline_mode = #tpu.pipeline_mode<synchronous>, transform_indices = @transform_7, window_bounds = array<i64: 15, 480>}, {transform_indices = @transform_8, window_bounds = array<i64: 15, 8>}, {transform_indices = @transform_9, window_bounds = array<i64: 15, 8>}]} {
    %c0 = arith.constant 0 : index
    %c0_0 = arith.constant 0 : index
    %c0_1 = arith.constant 0 : index
    %0 = vector.load %arg1[%c0, %c0_0, %c0_1] : memref<6x32x8xbf16, #tpu.memory_space<vmem>>, vector<6x32x8xbf16>
    %1 = arith.extf %0 : vector<6x32x8xbf16> to vector<6x32x8xf32>
    %c0_2 = arith.constant 0 : index
    %c0_3 = arith.constant 0 : index
    %2 = vector.load %arg2[%c0_2, %c0_3] : memref<64x32xbf16, #tpu.memory_space<vmem>>, vector<64x32xbf16>
    %c0_4 = arith.constant 0 : index
    %c0_5 = arith.constant 0 : index
    %3 = vector.load %arg3[%c0_4, %c0_5] : memref<64x32xbf16, #tpu.memory_space<vmem>>, vector<64x32xbf16>
    %c0_6 = arith.constant 0 : index
    %c0_7 = arith.constant 0 : index
    %4 = vector.load %arg4[%c0_6, %c0_7] : memref<64x1xf32, #tpu.memory_space<vmem>>, vector<64x1xf32>
    %c0_8 = arith.constant 0 : index
    %c0_9 = arith.constant 0 : index
    %5 = vector.load %arg5[%c0_8, %c0_9] : memref<32x64xbf16, #tpu.memory_space<vmem>>, vector<32x64xbf16>
    %c0_10 = arith.constant 0 : index
    %c0_11 = arith.constant 0 : index
    %6 = vector.load %arg6[%c0_10, %c0_11] : memref<32x1xf32, #tpu.memory_space<vmem>>, vector<32x1xf32>
    %7 = vector.extract_strided_slice %0 {offsets = [0, 0, 0], sizes = [1, 32, 8], strides = [1, 1, 1]} : vector<6x32x8xbf16> to vector<1x32x8xbf16>
    %8 = vector.shape_cast %7 : vector<1x32x8xbf16> to vector<32x8xbf16>
    %cst = arith.constant dense<0.000000e+00> : vector<64x8xf32>
    %9 = tpu.matmul %2, %8, %cst {dimension_numbers = #tpu.dot_dimension_numbers<[1], [0], [0], [1], [0, 0, 1, 1], [], []>} : vector<64x32xbf16>, vector<32x8xbf16>, vector<64x8xf32> -> vector<64x8xf32>
    %10 = vector.extract_strided_slice %0 {offsets = [1, 0, 0], sizes = [1, 32, 8], strides = [1, 1, 1]} : vector<6x32x8xbf16> to vector<1x32x8xbf16>
    %11 = vector.shape_cast %10 : vector<1x32x8xbf16> to vector<32x8xbf16>
    %cst_12 = arith.constant dense<0.000000e+00> : vector<64x8xf32>
    %12 = tpu.matmul %2, %11, %cst_12 {dimension_numbers = #tpu.dot_dimension_numbers<[1], [0], [0], [1], [0, 0, 1, 1], [], []>} : vector<64x32xbf16>, vector<32x8xbf16>, vector<64x8xf32> -> vector<64x8xf32>
    %13 = vector.extract_strided_slice %0 {offsets = [2, 0, 0], sizes = [1, 32, 8], strides = [1, 1, 1]} : vector<6x32x8xbf16> to vector<1x32x8xbf16>
    %14 = vector.shape_cast %13 : vector<1x32x8xbf16> to vector<32x8xbf16>
    %cst_13 = arith.constant dense<0.000000e+00> : vector<64x8xf32>
    %15 = tpu.matmul %2, %14, %cst_13 {dimension_numbers = #tpu.dot_dimension_numbers<[1], [0], [0], [1], [0, 0, 1, 1], [], []>} : vector<64x32xbf16>, vector<32x8xbf16>, vector<64x8xf32> -> vector<64x8xf32>
    %16 = vector.extract_strided_slice %0 {offsets = [3, 0, 0], sizes = [1, 32, 8], strides = [1, 1, 1]} : vector<6x32x8xbf16> to vector<1x32x8xbf16>
    %17 = vector.shape_cast %16 : vector<1x32x8xbf16> to vector<32x8xbf16>
    %cst_14 = arith.constant dense<0.000000e+00> : vector<64x8xf32>
    %18 = tpu.matmul %2, %17, %cst_14 {dimension_numbers = #tpu.dot_dimension_numbers<[1], [0], [0], [1], [0, 0, 1, 1], [], []>} : vector<64x32xbf16>, vector<32x8xbf16>, vector<64x8xf32> -> vector<64x8xf32>
    %19 = vector.extract_strided_slice %0 {offsets = [4, 0, 0], sizes = [1, 32, 8], strides = [1, 1, 1]} : vector<6x32x8xbf16> to vector<1x32x8xbf16>
    %20 = vector.shape_cast %19 : vector<1x32x8xbf16> to vector<32x8xbf16>
    %cst_15 = arith.constant dense<0.000000e+00> : vector<64x8xf32>
    %21 = tpu.matmul %2, %20, %cst_15 {dimension_numbers = #tpu.dot_dimension_numbers<[1], [0], [0], [1], [0, 0, 1, 1], [], []>} : vector<64x32xbf16>, vector<32x8xbf16>, vector<64x8xf32> -> vector<64x8xf32>
    %22 = vector.extract_strided_slice %0 {offsets = [1, 0, 0], sizes = [1, 32, 8], strides = [1, 1, 1]} : vector<6x32x8xbf16> to vector<1x32x8xbf16>
    %23 = vector.shape_cast %22 : vector<1x32x8xbf16> to vector<32x8xbf16>
    %cst_16 = arith.constant dense<0.000000e+00> : vector<64x8xf32>
    %24 = tpu.matmul %3, %23, %cst_16 {dimension_numbers = #tpu.dot_dimension_numbers<[1], [0], [0], [1], [0, 0, 1, 1], [], []>} : vector<64x32xbf16>, vector<32x8xbf16>, vector<64x8xf32> -> vector<64x8xf32>
    %25 = vector.extract_strided_slice %0 {offsets = [2, 0, 0], sizes = [1, 32, 8], strides = [1, 1, 1]} : vector<6x32x8xbf16> to vector<1x32x8xbf16>
    %26 = vector.shape_cast %25 : vector<1x32x8xbf16> to vector<32x8xbf16>
    %cst_17 = arith.constant dense<0.000000e+00> : vector<64x8xf32>
    %27 = tpu.matmul %3, %26, %cst_17 {dimension_numbers = #tpu.dot_dimension_numbers<[1], [0], [0], [1], [0, 0, 1, 1], [], []>} : vector<64x32xbf16>, vector<32x8xbf16>, vector<64x8xf32> -> vector<64x8xf32>
    %28 = vector.extract_strided_slice %0 {offsets = [3, 0, 0], sizes = [1, 32, 8], strides = [1, 1, 1]} : vector<6x32x8xbf16> to vector<1x32x8xbf16>
    %29 = vector.shape_cast %28 : vector<1x32x8xbf16> to vector<32x8xbf16>
    %cst_18 = arith.constant dense<0.000000e+00> : vector<64x8xf32>
    %30 = tpu.matmul %3, %29, %cst_18 {dimension_numbers = #tpu.dot_dimension_numbers<[1], [0], [0], [1], [0, 0, 1, 1], [], []>} : vector<64x32xbf16>, vector<32x8xbf16>, vector<64x8xf32> -> vector<64x8xf32>
    %31 = vector.extract_strided_slice %0 {offsets = [4, 0, 0], sizes = [1, 32, 8], strides = [1, 1, 1]} : vector<6x32x8xbf16> to vector<1x32x8xbf16>
    %32 = vector.shape_cast %31 : vector<1x32x8xbf16> to vector<32x8xbf16>
    %cst_19 = arith.constant dense<0.000000e+00> : vector<64x8xf32>
    %33 = tpu.matmul %3, %32, %cst_19 {dimension_numbers = #tpu.dot_dimension_numbers<[1], [0], [0], [1], [0, 0, 1, 1], [], []>} : vector<64x32xbf16>, vector<32x8xbf16>, vector<64x8xf32> -> vector<64x8xf32>
    %34 = vector.extract_strided_slice %0 {offsets = [5, 0, 0], sizes = [1, 32, 8], strides = [1, 1, 1]} : vector<6x32x8xbf16> to vector<1x32x8xbf16>
    %35 = vector.shape_cast %34 : vector<1x32x8xbf16> to vector<32x8xbf16>
    %cst_20 = arith.constant dense<0.000000e+00> : vector<64x8xf32>
    %36 = tpu.matmul %3, %35, %cst_20 {dimension_numbers = #tpu.dot_dimension_numbers<[1], [0], [0], [1], [0, 0, 1, 1], [], []>} : vector<64x32xbf16>, vector<32x8xbf16>, vector<64x8xf32> -> vector<64x8xf32>
    %37 = arith.addf %9, %24 : vector<64x8xf32>
    %38 = vector.broadcast %4 : vector<64x1xf32> to vector<64x8xf32>
    %39 = arith.addf %37, %38 : vector<64x8xf32>
    %cst_21 = arith.constant 0.000000e+00 : f32
    %40 = vector.broadcast %cst_21 : f32 to vector<64x8xf32>
    %41 = arith.maximumf %39, %40 : vector<64x8xf32>
    %42 = arith.truncf %41 : vector<64x8xf32> to vector<64x8xbf16>
    %cst_22 = arith.constant dense<0.000000e+00> : vector<32x8xf32>
    %43 = tpu.matmul %5, %42, %cst_22 {dimension_numbers = #tpu.dot_dimension_numbers<[1], [0], [0], [1], [0, 0, 1, 1], [], []>} : vector<32x64xbf16>, vector<64x8xbf16>, vector<32x8xf32> -> vector<32x8xf32>
    %44 = vector.broadcast %6 : vector<32x1xf32> to vector<32x8xf32>
    %45 = arith.addf %43, %44 : vector<32x8xf32>
    %cst_23 = arith.constant 0.000000e+00 : f32
    %46 = vector.broadcast %cst_23 : f32 to vector<32x8xf32>
    %47 = arith.maximumf %45, %46 : vector<32x8xf32>
    %48 = vector.extract_strided_slice %1 {offsets = [0, 0, 0], sizes = [1, 32, 8], strides = [1, 1, 1]} : vector<6x32x8xf32> to vector<1x32x8xf32>
    %49 = vector.shape_cast %48 : vector<1x32x8xf32> to vector<32x8xf32>
    %50 = vector.extract_strided_slice %1 {offsets = [1, 0, 0], sizes = [1, 32, 8], strides = [1, 1, 1]} : vector<6x32x8xf32> to vector<1x32x8xf32>
    %51 = vector.shape_cast %50 : vector<1x32x8xf32> to vector<32x8xf32>
    %52 = arith.mulf %49, %51 : vector<32x8xf32>
    %53 = arith.addf %9, %27 : vector<64x8xf32>
    %54 = vector.broadcast %4 : vector<64x1xf32> to vector<64x8xf32>
    %55 = arith.addf %53, %54 : vector<64x8xf32>
    %cst_24 = arith.constant 0.000000e+00 : f32
    %56 = vector.broadcast %cst_24 : f32 to vector<64x8xf32>
    %57 = arith.maximumf %55, %56 : vector<64x8xf32>
    %58 = arith.truncf %57 : vector<64x8xf32> to vector<64x8xbf16>
    %cst_25 = arith.constant dense<0.000000e+00> : vector<32x8xf32>
    %59 = tpu.matmul %5, %58, %cst_25 {dimension_numbers = #tpu.dot_dimension_numbers<[1], [0], [0], [1], [0, 0, 1, 1], [], []>} : vector<32x64xbf16>, vector<64x8xbf16>, vector<32x8xf32> -> vector<32x8xf32>
    %60 = vector.broadcast %6 : vector<32x1xf32> to vector<32x8xf32>
    %61 = arith.addf %59, %60 : vector<32x8xf32>
    %cst_26 = arith.constant 0.000000e+00 : f32
    %62 = vector.broadcast %cst_26 : f32 to vector<32x8xf32>
    %63 = arith.maximumf %61, %62 : vector<32x8xf32>
    %64 = vector.extract_strided_slice %1 {offsets = [0, 0, 0], sizes = [1, 32, 8], strides = [1, 1, 1]} : vector<6x32x8xf32> to vector<1x32x8xf32>
    %65 = vector.shape_cast %64 : vector<1x32x8xf32> to vector<32x8xf32>
    %66 = vector.extract_strided_slice %1 {offsets = [2, 0, 0], sizes = [1, 32, 8], strides = [1, 1, 1]} : vector<6x32x8xf32> to vector<1x32x8xf32>
    %67 = vector.shape_cast %66 : vector<1x32x8xf32> to vector<32x8xf32>
    %68 = arith.mulf %65, %67 : vector<32x8xf32>
    %69 = arith.addf %9, %30 : vector<64x8xf32>
    %70 = vector.broadcast %4 : vector<64x1xf32> to vector<64x8xf32>
    %71 = arith.addf %69, %70 : vector<64x8xf32>
    %cst_27 = arith.constant 0.000000e+00 : f32
    %72 = vector.broadcast %cst_27 : f32 to vector<64x8xf32>
    %73 = arith.maximumf %71, %72 : vector<64x8xf32>
    %74 = arith.truncf %73 : vector<64x8xf32> to vector<64x8xbf16>
    %cst_28 = arith.constant dense<0.000000e+00> : vector<32x8xf32>
    %75 = tpu.matmul %5, %74, %cst_28 {dimension_numbers = #tpu.dot_dimension_numbers<[1], [0], [0], [1], [0, 0, 1, 1], [], []>} : vector<32x64xbf16>, vector<64x8xbf16>, vector<32x8xf32> -> vector<32x8xf32>
    %76 = vector.broadcast %6 : vector<32x1xf32> to vector<32x8xf32>
    %77 = arith.addf %75, %76 : vector<32x8xf32>
    %cst_29 = arith.constant 0.000000e+00 : f32
    %78 = vector.broadcast %cst_29 : f32 to vector<32x8xf32>
    %79 = arith.maximumf %77, %78 : vector<32x8xf32>
    %80 = vector.extract_strided_slice %1 {offsets = [0, 0, 0], sizes = [1, 32, 8], strides = [1, 1, 1]} : vector<6x32x8xf32> to vector<1x32x8xf32>
    %81 = vector.shape_cast %80 : vector<1x32x8xf32> to vector<32x8xf32>
    %82 = vector.extract_strided_slice %1 {offsets = [3, 0, 0], sizes = [1, 32, 8], strides = [1, 1, 1]} : vector<6x32x8xf32> to vector<1x32x8xf32>
    %83 = vector.shape_cast %82 : vector<1x32x8xf32> to vector<32x8xf32>
    %84 = arith.mulf %81, %83 : vector<32x8xf32>
    %85 = arith.addf %9, %33 : vector<64x8xf32>
    %86 = vector.broadcast %4 : vector<64x1xf32> to vector<64x8xf32>
    %87 = arith.addf %85, %86 : vector<64x8xf32>
    %cst_30 = arith.constant 0.000000e+00 : f32
    %88 = vector.broadcast %cst_30 : f32 to vector<64x8xf32>
    %89 = arith.maximumf %87, %88 : vector<64x8xf32>
    %90 = arith.truncf %89 : vector<64x8xf32> to vector<64x8xbf16>
    %cst_31 = arith.constant dense<0.000000e+00> : vector<32x8xf32>
    %91 = tpu.matmul %5, %90, %cst_31 {dimension_numbers = #tpu.dot_dimension_numbers<[1], [0], [0], [1], [0, 0, 1, 1], [], []>} : vector<32x64xbf16>, vector<64x8xbf16>, vector<32x8xf32> -> vector<32x8xf32>
    %92 = vector.broadcast %6 : vector<32x1xf32> to vector<32x8xf32>
    %93 = arith.addf %91, %92 : vector<32x8xf32>
    %cst_32 = arith.constant 0.000000e+00 : f32
    %94 = vector.broadcast %cst_32 : f32 to vector<32x8xf32>
    %95 = arith.maximumf %93, %94 : vector<32x8xf32>
    %96 = vector.extract_strided_slice %1 {offsets = [0, 0, 0], sizes = [1, 32, 8], strides = [1, 1, 1]} : vector<6x32x8xf32> to vector<1x32x8xf32>
    %97 = vector.shape_cast %96 : vector<1x32x8xf32> to vector<32x8xf32>
    %98 = vector.extract_strided_slice %1 {offsets = [4, 0, 0], sizes = [1, 32, 8], strides = [1, 1, 1]} : vector<6x32x8xf32> to vector<1x32x8xf32>
    %99 = vector.shape_cast %98 : vector<1x32x8xf32> to vector<32x8xf32>
    %100 = arith.mulf %97, %99 : vector<32x8xf32>
    %101 = arith.addf %9, %36 : vector<64x8xf32>
    %102 = vector.broadcast %4 : vector<64x1xf32> to vector<64x8xf32>
    %103 = arith.addf %101, %102 : vector<64x8xf32>
    %cst_33 = arith.constant 0.000000e+00 : f32
    %104 = vector.broadcast %cst_33 : f32 to vector<64x8xf32>
    %105 = arith.maximumf %103, %104 : vector<64x8xf32>
    %106 = arith.truncf %105 : vector<64x8xf32> to vector<64x8xbf16>
    %cst_34 = arith.constant dense<0.000000e+00> : vector<32x8xf32>
    %107 = tpu.matmul %5, %106, %cst_34 {dimension_numbers = #tpu.dot_dimension_numbers<[1], [0], [0], [1], [0, 0, 1, 1], [], []>} : vector<32x64xbf16>, vector<64x8xbf16>, vector<32x8xf32> -> vector<32x8xf32>
    %108 = vector.broadcast %6 : vector<32x1xf32> to vector<32x8xf32>
    %109 = arith.addf %107, %108 : vector<32x8xf32>
    %cst_35 = arith.constant 0.000000e+00 : f32
    %110 = vector.broadcast %cst_35 : f32 to vector<32x8xf32>
    %111 = arith.maximumf %109, %110 : vector<32x8xf32>
    %112 = vector.extract_strided_slice %1 {offsets = [0, 0, 0], sizes = [1, 32, 8], strides = [1, 1, 1]} : vector<6x32x8xf32> to vector<1x32x8xf32>
    %113 = vector.shape_cast %112 : vector<1x32x8xf32> to vector<32x8xf32>
    %114 = vector.extract_strided_slice %1 {offsets = [5, 0, 0], sizes = [1, 32, 8], strides = [1, 1, 1]} : vector<6x32x8xf32> to vector<1x32x8xf32>
    %115 = vector.shape_cast %114 : vector<1x32x8xf32> to vector<32x8xf32>
    %116 = arith.mulf %113, %115 : vector<32x8xf32>
    %117 = arith.addf %12, %27 : vector<64x8xf32>
    %118 = vector.broadcast %4 : vector<64x1xf32> to vector<64x8xf32>
    %119 = arith.addf %117, %118 : vector<64x8xf32>
    %cst_36 = arith.constant 0.000000e+00 : f32
    %120 = vector.broadcast %cst_36 : f32 to vector<64x8xf32>
    %121 = arith.maximumf %119, %120 : vector<64x8xf32>
    %122 = arith.truncf %121 : vector<64x8xf32> to vector<64x8xbf16>
    %cst_37 = arith.constant dense<0.000000e+00> : vector<32x8xf32>
    %123 = tpu.matmul %5, %122, %cst_37 {dimension_numbers = #tpu.dot_dimension_numbers<[1], [0], [0], [1], [0, 0, 1, 1], [], []>} : vector<32x64xbf16>, vector<64x8xbf16>, vector<32x8xf32> -> vector<32x8xf32>
    %124 = vector.broadcast %6 : vector<32x1xf32> to vector<32x8xf32>
    %125 = arith.addf %123, %124 : vector<32x8xf32>
    %cst_38 = arith.constant 0.000000e+00 : f32
    %126 = vector.broadcast %cst_38 : f32 to vector<32x8xf32>
    %127 = arith.maximumf %125, %126 : vector<32x8xf32>
    %128 = vector.extract_strided_slice %1 {offsets = [1, 0, 0], sizes = [1, 32, 8], strides = [1, 1, 1]} : vector<6x32x8xf32> to vector<1x32x8xf32>
    %129 = vector.shape_cast %128 : vector<1x32x8xf32> to vector<32x8xf32>
    %130 = vector.extract_strided_slice %1 {offsets = [2, 0, 0], sizes = [1, 32, 8], strides = [1, 1, 1]} : vector<6x32x8xf32> to vector<1x32x8xf32>
    %131 = vector.shape_cast %130 : vector<1x32x8xf32> to vector<32x8xf32>
    %132 = arith.mulf %129, %131 : vector<32x8xf32>
    %133 = arith.addf %12, %30 : vector<64x8xf32>
    %134 = vector.broadcast %4 : vector<64x1xf32> to vector<64x8xf32>
    %135 = arith.addf %133, %134 : vector<64x8xf32>
    %cst_39 = arith.constant 0.000000e+00 : f32
    %136 = vector.broadcast %cst_39 : f32 to vector<64x8xf32>
    %137 = arith.maximumf %135, %136 : vector<64x8xf32>
    %138 = arith.truncf %137 : vector<64x8xf32> to vector<64x8xbf16>
    %cst_40 = arith.constant dense<0.000000e+00> : vector<32x8xf32>
    %139 = tpu.matmul %5, %138, %cst_40 {dimension_numbers = #tpu.dot_dimension_numbers<[1], [0], [0], [1], [0, 0, 1, 1], [], []>} : vector<32x64xbf16>, vector<64x8xbf16>, vector<32x8xf32> -> vector<32x8xf32>
    %140 = vector.broadcast %6 : vector<32x1xf32> to vector<32x8xf32>
    %141 = arith.addf %139, %140 : vector<32x8xf32>
    %cst_41 = arith.constant 0.000000e+00 : f32
    %142 = vector.broadcast %cst_41 : f32 to vector<32x8xf32>
    %143 = arith.maximumf %141, %142 : vector<32x8xf32>
    %144 = vector.extract_strided_slice %1 {offsets = [1, 0, 0], sizes = [1, 32, 8], strides = [1, 1, 1]} : vector<6x32x8xf32> to vector<1x32x8xf32>
    %145 = vector.shape_cast %144 : vector<1x32x8xf32> to vector<32x8xf32>
    %146 = vector.extract_strided_slice %1 {offsets = [3, 0, 0], sizes = [1, 32, 8], strides = [1, 1, 1]} : vector<6x32x8xf32> to vector<1x32x8xf32>
    %147 = vector.shape_cast %146 : vector<1x32x8xf32> to vector<32x8xf32>
    %148 = arith.mulf %145, %147 : vector<32x8xf32>
    %149 = arith.addf %12, %33 : vector<64x8xf32>
    %150 = vector.broadcast %4 : vector<64x1xf32> to vector<64x8xf32>
    %151 = arith.addf %149, %150 : vector<64x8xf32>
    %cst_42 = arith.constant 0.000000e+00 : f32
    %152 = vector.broadcast %cst_42 : f32 to vector<64x8xf32>
    %153 = arith.maximumf %151, %152 : vector<64x8xf32>
    %154 = arith.truncf %153 : vector<64x8xf32> to vector<64x8xbf16>
    %cst_43 = arith.constant dense<0.000000e+00> : vector<32x8xf32>
    %155 = tpu.matmul %5, %154, %cst_43 {dimension_numbers = #tpu.dot_dimension_numbers<[1], [0], [0], [1], [0, 0, 1, 1], [], []>} : vector<32x64xbf16>, vector<64x8xbf16>, vector<32x8xf32> -> vector<32x8xf32>
    %156 = vector.broadcast %6 : vector<32x1xf32> to vector<32x8xf32>
    %157 = arith.addf %155, %156 : vector<32x8xf32>
    %cst_44 = arith.constant 0.000000e+00 : f32
    %158 = vector.broadcast %cst_44 : f32 to vector<32x8xf32>
    %159 = arith.maximumf %157, %158 : vector<32x8xf32>
    %160 = vector.extract_strided_slice %1 {offsets = [1, 0, 0], sizes = [1, 32, 8], strides = [1, 1, 1]} : vector<6x32x8xf32> to vector<1x32x8xf32>
    %161 = vector.shape_cast %160 : vector<1x32x8xf32> to vector<32x8xf32>
    %162 = vector.extract_strided_slice %1 {offsets = [4, 0, 0], sizes = [1, 32, 8], strides = [1, 1, 1]} : vector<6x32x8xf32> to vector<1x32x8xf32>
    %163 = vector.shape_cast %162 : vector<1x32x8xf32> to vector<32x8xf32>
    %164 = arith.mulf %161, %163 : vector<32x8xf32>
    %165 = arith.addf %12, %36 : vector<64x8xf32>
    %166 = vector.broadcast %4 : vector<64x1xf32> to vector<64x8xf32>
    %167 = arith.addf %165, %166 : vector<64x8xf32>
    %cst_45 = arith.constant 0.000000e+00 : f32
    %168 = vector.broadcast %cst_45 : f32 to vector<64x8xf32>
    %169 = arith.maximumf %167, %168 : vector<64x8xf32>
    %170 = arith.truncf %169 : vector<64x8xf32> to vector<64x8xbf16>
    %cst_46 = arith.constant dense<0.000000e+00> : vector<32x8xf32>
    %171 = tpu.matmul %5, %170, %cst_46 {dimension_numbers = #tpu.dot_dimension_numbers<[1], [0], [0], [1], [0, 0, 1, 1], [], []>} : vector<32x64xbf16>, vector<64x8xbf16>, vector<32x8xf32> -> vector<32x8xf32>
    %172 = vector.broadcast %6 : vector<32x1xf32> to vector<32x8xf32>
    %173 = arith.addf %171, %172 : vector<32x8xf32>
    %cst_47 = arith.constant 0.000000e+00 : f32
    %174 = vector.broadcast %cst_47 : f32 to vector<32x8xf32>
    %175 = arith.maximumf %173, %174 : vector<32x8xf32>
    %176 = vector.extract_strided_slice %1 {offsets = [1, 0, 0], sizes = [1, 32, 8], strides = [1, 1, 1]} : vector<6x32x8xf32> to vector<1x32x8xf32>
    %177 = vector.shape_cast %176 : vector<1x32x8xf32> to vector<32x8xf32>
    %178 = vector.extract_strided_slice %1 {offsets = [5, 0, 0], sizes = [1, 32, 8], strides = [1, 1, 1]} : vector<6x32x8xf32> to vector<1x32x8xf32>
    %179 = vector.shape_cast %178 : vector<1x32x8xf32> to vector<32x8xf32>
    %180 = arith.mulf %177, %179 : vector<32x8xf32>
    %181 = arith.addf %15, %30 : vector<64x8xf32>
    %182 = vector.broadcast %4 : vector<64x1xf32> to vector<64x8xf32>
    %183 = arith.addf %181, %182 : vector<64x8xf32>
    %cst_48 = arith.constant 0.000000e+00 : f32
    %184 = vector.broadcast %cst_48 : f32 to vector<64x8xf32>
    %185 = arith.maximumf %183, %184 : vector<64x8xf32>
    %186 = arith.truncf %185 : vector<64x8xf32> to vector<64x8xbf16>
    %cst_49 = arith.constant dense<0.000000e+00> : vector<32x8xf32>
    %187 = tpu.matmul %5, %186, %cst_49 {dimension_numbers = #tpu.dot_dimension_numbers<[1], [0], [0], [1], [0, 0, 1, 1], [], []>} : vector<32x64xbf16>, vector<64x8xbf16>, vector<32x8xf32> -> vector<32x8xf32>
    %188 = vector.broadcast %6 : vector<32x1xf32> to vector<32x8xf32>
    %189 = arith.addf %187, %188 : vector<32x8xf32>
    %cst_50 = arith.constant 0.000000e+00 : f32
    %190 = vector.broadcast %cst_50 : f32 to vector<32x8xf32>
    %191 = arith.maximumf %189, %190 : vector<32x8xf32>
    %192 = vector.extract_strided_slice %1 {offsets = [2, 0, 0], sizes = [1, 32, 8], strides = [1, 1, 1]} : vector<6x32x8xf32> to vector<1x32x8xf32>
    %193 = vector.shape_cast %192 : vector<1x32x8xf32> to vector<32x8xf32>
    %194 = vector.extract_strided_slice %1 {offsets = [3, 0, 0], sizes = [1, 32, 8], strides = [1, 1, 1]} : vector<6x32x8xf32> to vector<1x32x8xf32>
    %195 = vector.shape_cast %194 : vector<1x32x8xf32> to vector<32x8xf32>
    %196 = arith.mulf %193, %195 : vector<32x8xf32>
    %197 = arith.addf %15, %33 : vector<64x8xf32>
    %198 = vector.broadcast %4 : vector<64x1xf32> to vector<64x8xf32>
    %199 = arith.addf %197, %198 : vector<64x8xf32>
    %cst_51 = arith.constant 0.000000e+00 : f32
    %200 = vector.broadcast %cst_51 : f32 to vector<64x8xf32>
    %201 = arith.maximumf %199, %200 : vector<64x8xf32>
    %202 = arith.truncf %201 : vector<64x8xf32> to vector<64x8xbf16>
    %cst_52 = arith.constant dense<0.000000e+00> : vector<32x8xf32>
    %203 = tpu.matmul %5, %202, %cst_52 {dimension_numbers = #tpu.dot_dimension_numbers<[1], [0], [0], [1], [0, 0, 1, 1], [], []>} : vector<32x64xbf16>, vector<64x8xbf16>, vector<32x8xf32> -> vector<32x8xf32>
    %204 = vector.broadcast %6 : vector<32x1xf32> to vector<32x8xf32>
    %205 = arith.addf %203, %204 : vector<32x8xf32>
    %cst_53 = arith.constant 0.000000e+00 : f32
    %206 = vector.broadcast %cst_53 : f32 to vector<32x8xf32>
    %207 = arith.maximumf %205, %206 : vector<32x8xf32>
    %208 = vector.extract_strided_slice %1 {offsets = [2, 0, 0], sizes = [1, 32, 8], strides = [1, 1, 1]} : vector<6x32x8xf32> to vector<1x32x8xf32>
    %209 = vector.shape_cast %208 : vector<1x32x8xf32> to vector<32x8xf32>
    %210 = vector.extract_strided_slice %1 {offsets = [4, 0, 0], sizes = [1, 32, 8], strides = [1, 1, 1]} : vector<6x32x8xf32> to vector<1x32x8xf32>
    %211 = vector.shape_cast %210 : vector<1x32x8xf32> to vector<32x8xf32>
    %212 = arith.mulf %209, %211 : vector<32x8xf32>
    %213 = arith.addf %15, %36 : vector<64x8xf32>
    %214 = vector.broadcast %4 : vector<64x1xf32> to vector<64x8xf32>
    %215 = arith.addf %213, %214 : vector<64x8xf32>
    %cst_54 = arith.constant 0.000000e+00 : f32
    %216 = vector.broadcast %cst_54 : f32 to vector<64x8xf32>
    %217 = arith.maximumf %215, %216 : vector<64x8xf32>
    %218 = arith.truncf %217 : vector<64x8xf32> to vector<64x8xbf16>
    %cst_55 = arith.constant dense<0.000000e+00> : vector<32x8xf32>
    %219 = tpu.matmul %5, %218, %cst_55 {dimension_numbers = #tpu.dot_dimension_numbers<[1], [0], [0], [1], [0, 0, 1, 1], [], []>} : vector<32x64xbf16>, vector<64x8xbf16>, vector<32x8xf32> -> vector<32x8xf32>
    %220 = vector.broadcast %6 : vector<32x1xf32> to vector<32x8xf32>
    %221 = arith.addf %219, %220 : vector<32x8xf32>
    %cst_56 = arith.constant 0.000000e+00 : f32
    %222 = vector.broadcast %cst_56 : f32 to vector<32x8xf32>
    %223 = arith.maximumf %221, %222 : vector<32x8xf32>
    %224 = vector.extract_strided_slice %1 {offsets = [2, 0, 0], sizes = [1, 32, 8], strides = [1, 1, 1]} : vector<6x32x8xf32> to vector<1x32x8xf32>
    %225 = vector.shape_cast %224 : vector<1x32x8xf32> to vector<32x8xf32>
    %226 = vector.extract_strided_slice %1 {offsets = [5, 0, 0], sizes = [1, 32, 8], strides = [1, 1, 1]} : vector<6x32x8xf32> to vector<1x32x8xf32>
    %227 = vector.shape_cast %226 : vector<1x32x8xf32> to vector<32x8xf32>
    %228 = arith.mulf %225, %227 : vector<32x8xf32>
    %229 = arith.addf %18, %33 : vector<64x8xf32>
    %230 = vector.broadcast %4 : vector<64x1xf32> to vector<64x8xf32>
    %231 = arith.addf %229, %230 : vector<64x8xf32>
    %cst_57 = arith.constant 0.000000e+00 : f32
    %232 = vector.broadcast %cst_57 : f32 to vector<64x8xf32>
    %233 = arith.maximumf %231, %232 : vector<64x8xf32>
    %234 = arith.truncf %233 : vector<64x8xf32> to vector<64x8xbf16>
    %cst_58 = arith.constant dense<0.000000e+00> : vector<32x8xf32>
    %235 = tpu.matmul %5, %234, %cst_58 {dimension_numbers = #tpu.dot_dimension_numbers<[1], [0], [0], [1], [0, 0, 1, 1], [], []>} : vector<32x64xbf16>, vector<64x8xbf16>, vector<32x8xf32> -> vector<32x8xf32>
    %236 = vector.broadcast %6 : vector<32x1xf32> to vector<32x8xf32>
    %237 = arith.addf %235, %236 : vector<32x8xf32>
    %cst_59 = arith.constant 0.000000e+00 : f32
    %238 = vector.broadcast %cst_59 : f32 to vector<32x8xf32>
    %239 = arith.maximumf %237, %238 : vector<32x8xf32>
    %240 = vector.extract_strided_slice %1 {offsets = [3, 0, 0], sizes = [1, 32, 8], strides = [1, 1, 1]} : vector<6x32x8xf32> to vector<1x32x8xf32>
    %241 = vector.shape_cast %240 : vector<1x32x8xf32> to vector<32x8xf32>
    %242 = vector.extract_strided_slice %1 {offsets = [4, 0, 0], sizes = [1, 32, 8], strides = [1, 1, 1]} : vector<6x32x8xf32> to vector<1x32x8xf32>
    %243 = vector.shape_cast %242 : vector<1x32x8xf32> to vector<32x8xf32>
    %244 = arith.mulf %241, %243 : vector<32x8xf32>
    %245 = arith.addf %18, %36 : vector<64x8xf32>
    %246 = vector.broadcast %4 : vector<64x1xf32> to vector<64x8xf32>
    %247 = arith.addf %245, %246 : vector<64x8xf32>
    %cst_60 = arith.constant 0.000000e+00 : f32
    %248 = vector.broadcast %cst_60 : f32 to vector<64x8xf32>
    %249 = arith.maximumf %247, %248 : vector<64x8xf32>
    %250 = arith.truncf %249 : vector<64x8xf32> to vector<64x8xbf16>
    %cst_61 = arith.constant dense<0.000000e+00> : vector<32x8xf32>
    %251 = tpu.matmul %5, %250, %cst_61 {dimension_numbers = #tpu.dot_dimension_numbers<[1], [0], [0], [1], [0, 0, 1, 1], [], []>} : vector<32x64xbf16>, vector<64x8xbf16>, vector<32x8xf32> -> vector<32x8xf32>
    %252 = vector.broadcast %6 : vector<32x1xf32> to vector<32x8xf32>
    %253 = arith.addf %251, %252 : vector<32x8xf32>
    %cst_62 = arith.constant 0.000000e+00 : f32
    %254 = vector.broadcast %cst_62 : f32 to vector<32x8xf32>
    %255 = arith.maximumf %253, %254 : vector<32x8xf32>
    %256 = vector.extract_strided_slice %1 {offsets = [3, 0, 0], sizes = [1, 32, 8], strides = [1, 1, 1]} : vector<6x32x8xf32> to vector<1x32x8xf32>
    %257 = vector.shape_cast %256 : vector<1x32x8xf32> to vector<32x8xf32>
    %258 = vector.extract_strided_slice %1 {offsets = [5, 0, 0], sizes = [1, 32, 8], strides = [1, 1, 1]} : vector<6x32x8xf32> to vector<1x32x8xf32>
    %259 = vector.shape_cast %258 : vector<1x32x8xf32> to vector<32x8xf32>
    %260 = arith.mulf %257, %259 : vector<32x8xf32>
    %261 = arith.addf %21, %36 : vector<64x8xf32>
    %262 = vector.broadcast %4 : vector<64x1xf32> to vector<64x8xf32>
    %263 = arith.addf %261, %262 : vector<64x8xf32>
    %cst_63 = arith.constant 0.000000e+00 : f32
    %264 = vector.broadcast %cst_63 : f32 to vector<64x8xf32>
    %265 = arith.maximumf %263, %264 : vector<64x8xf32>
    %266 = arith.truncf %265 : vector<64x8xf32> to vector<64x8xbf16>
    %cst_64 = arith.constant dense<0.000000e+00> : vector<32x8xf32>
    %267 = tpu.matmul %5, %266, %cst_64 {dimension_numbers = #tpu.dot_dimension_numbers<[1], [0], [0], [1], [0, 0, 1, 1], [], []>} : vector<32x64xbf16>, vector<64x8xbf16>, vector<32x8xf32> -> vector<32x8xf32>
    %268 = vector.broadcast %6 : vector<32x1xf32> to vector<32x8xf32>
    %269 = arith.addf %267, %268 : vector<32x8xf32>
    %cst_65 = arith.constant 0.000000e+00 : f32
    %270 = vector.broadcast %cst_65 : f32 to vector<32x8xf32>
    %271 = arith.maximumf %269, %270 : vector<32x8xf32>
    %272 = vector.extract_strided_slice %1 {offsets = [4, 0, 0], sizes = [1, 32, 8], strides = [1, 1, 1]} : vector<6x32x8xf32> to vector<1x32x8xf32>
    %273 = vector.shape_cast %272 : vector<1x32x8xf32> to vector<32x8xf32>
    %274 = vector.extract_strided_slice %1 {offsets = [5, 0, 0], sizes = [1, 32, 8], strides = [1, 1, 1]} : vector<6x32x8xf32> to vector<1x32x8xf32>
    %275 = vector.shape_cast %274 : vector<1x32x8xf32> to vector<32x8xf32>
    %276 = arith.mulf %273, %275 : vector<32x8xf32>
    %277 = tpu.concatenate %47, %63, %79, %95, %111, %127, %143, %159, %175, %191, %207, %223, %239, %255, %271 in 0 : vector<32x8xf32>, vector<32x8xf32>, vector<32x8xf32>, vector<32x8xf32>, vector<32x8xf32>, vector<32x8xf32>, vector<32x8xf32>, vector<32x8xf32>, vector<32x8xf32>, vector<32x8xf32>, vector<32x8xf32>, vector<32x8xf32>, vector<32x8xf32>, vector<32x8xf32>, vector<32x8xf32> -> vector<480x8xf32>
    %278 = tpu.concatenate %52, %68, %84, %100, %116, %132, %148, %164, %180, %196, %212, %228, %244, %260, %276 in 0 : vector<32x8xf32>, vector<32x8xf32>, vector<32x8xf32>, vector<32x8xf32>, vector<32x8xf32>, vector<32x8xf32>, vector<32x8xf32>, vector<32x8xf32>, vector<32x8xf32>, vector<32x8xf32>, vector<32x8xf32>, vector<32x8xf32>, vector<32x8xf32>, vector<32x8xf32>, vector<32x8xf32> -> vector<480x8xf32>
    %c0_66 = arith.constant 0 : index
    %c0_67 = arith.constant 0 : index
    %279 = vector.load %arg7[%c0_66, %c0_67] : memref<15x480xf32, #tpu.memory_space<vmem>>, vector<15x480xf32>
    %cst_68 = arith.constant dense<0.000000e+00> : vector<15x8xf32>
    %280 = tpu.matmul %279, %277, %cst_68 {dimension_numbers = #tpu.dot_dimension_numbers<[1], [0], [0], [1], [0, 0, 1, 1], [], []>} : vector<15x480xf32>, vector<480x8xf32>, vector<15x8xf32> -> vector<15x8xf32>
    %c0_69 = arith.constant 0 : index
    %c0_70 = arith.constant 0 : index
    %281 = vector.load %arg9[%c0_69, %c0_70] : memref<15x8xf32, #tpu.memory_space<vmem>>, vector<15x8xf32>
    tpu.vector_store %arg9[%c0_69, %c0_70], %280 {strides = array<i32>} : memref<15x8xf32, #tpu.memory_space<vmem>>, vector<15x8xf32>,
    %c0_71 = arith.constant 0 : index
    %c0_72 = arith.constant 0 : index
    %282 = vector.load %arg8[%c0_71, %c0_72] : memref<15x480xf32, #tpu.memory_space<vmem>>, vector<15x480xf32>
    %cst_73 = arith.constant dense<0.000000e+00> : vector<15x8xf32>
    %283 = tpu.matmul %282, %278, %cst_73 {dimension_numbers = #tpu.dot_dimension_numbers<[1], [0], [0], [1], [0, 0, 1, 1], [], []>} : vector<15x480xf32>, vector<480x8xf32>, vector<15x8xf32> -> vector<15x8xf32>
    %c0_74 = arith.constant 0 : index
    %c0_75 = arith.constant 0 : index
    %284 = vector.load %arg10[%c0_74, %c0_75] : memref<15x8xf32, #tpu.memory_space<vmem>>, vector<15x8xf32>
    tpu.vector_store %arg10[%c0_74, %c0_75], %283 {strides = array<i32>} : memref<15x8xf32, #tpu.memory_space<vmem>>, vector<15x8xf32>,
    return
  }
  func.func @transform_0(%arg0: i32) -> (i32, i32, i32) {
    %c0_i32 = arith.constant 0 : i32
    %c0_i32_0 = arith.constant 0 : i32
    %c0_i32_1 = arith.constant 0 : i32
    return %c0_i32, %c0_i32_0, %arg0 : i32, i32, i32
  }
  func.func @transform_1(%arg0: i32) -> (i32, i32) {
    %c0_i32 = arith.constant 0 : i32
    %c0_i32_0 = arith.constant 0 : i32
    %c0_i32_1 = arith.constant 0 : i32
    return %c0_i32, %c0_i32_0 : i32, i32
  }
  func.func @transform_2(%arg0: i32) -> (i32, i32) {
    %c0_i32 = arith.constant 0 : i32
    %c0_i32_0 = arith.constant 0 : i32
    %c0_i32_1 = arith.constant 0 : i32
    return %c0_i32, %c0_i32_0 : i32, i32
  }
  func.func @transform_3(%arg0: i32) -> (i32, i32) {
    %c0_i32 = arith.constant 0 : i32
    %c0_i32_0 = arith.constant 0 : i32
    %c0_i32_1 = arith.constant 0 : i32
    return %c0_i32, %c0_i32_0 : i32, i32
  }
  func.func @transform_4(%arg0: i32) -> (i32, i32) {
    %c0_i32 = arith.constant 0 : i32
    %c0_i32_0 = arith.constant 0 : i32
    %c0_i32_1 = arith.constant 0 : i32
    return %c0_i32, %c0_i32_0 : i32, i32
  }
  func.func @transform_5(%arg0: i32) -> (i32, i32) {
    %c0_i32 = arith.constant 0 : i32
    %c0_i32_0 = arith.constant 0 : i32
    %c0_i32_1 = arith.constant 0 : i32
    return %c0_i32, %c0_i32_0 : i32, i32
  }
  func.func @transform_6(%arg0: i32) -> (i32, i32) {
    %c0_i32 = arith.constant 0 : i32
    %c0_i32_0 = arith.constant 0 : i32
    %c0_i32_1 = arith.constant 0 : i32
    return %c0_i32, %c0_i32_0 : i32, i32
  }
  func.func @transform_7(%arg0: i32) -> (i32, i32) {
    %c0_i32 = arith.constant 0 : i32
    %c0_i32_0 = arith.constant 0 : i32
    %c0_i32_1 = arith.constant 0 : i32
    return %c0_i32, %c0_i32_0 : i32, i32
  }
  func.func @transform_8(%arg0: i32) -> (i32, i32) {
    %c0_i32 = arith.constant 0 : i32
    %c0_i32_0 = arith.constant 0 : i32
    return %c0_i32, %arg0 : i32, i32
  }
  func.func @transform_9(%arg0: i32) -> (i32, i32) {
    %c0_i32 = arith.constant 0 : i32
    %c0_i32_0 = arith.constant 0 : i32
    return %c0_i32, %arg0 : i32, i32
  }
}

</mosaic_0001>

<bundles_post_ra>
// kernel: autofi_forward.1
= control target key start
LH: loop header
LB: loop body
LE: loop exit
PB: predicated region body
PF: predicated region fallthrough
CT: control target
= control target key end

     0   :  { %v3412_v3 = vmov 0   ;;  %vm144_vm0 = vcmask 261120   ;;  %vm932_vm1 = vcmask 523264   ;;  %vm2251_vm2 = vcmask 785408   ;;  %s5091_s0 = inlined_call_operand.vmem [shape: bf16[6,32,8], index: 0, kind: input, shape index: {}]   ;;  %s5092_s1 = inlined_call_operand.vmem [shape: bf16[64,32], index: 1, kind: input, shape index: {}]   ;;  %s5093_s2 = inlined_call_operand.vmem [shape: bf16[64,32], index: 2, kind: input, shape index: {}]   ;;  %s5094_s3 = inlined_call_operand.vmem [shape: f32[64,1], index: 3, kind: input, shape index: {}]   ;;  %s5095_s5 = inlined_call_operand.vmem [shape: f32[32,1], index: 5, kind: input, shape index: {}]   ;;  %s5096_s4 = inlined_call_operand.vmem [shape: bf16[32,64], index: 4, kind: input, shape index: {}]   ;;  %s5097_s7 = inlined_call_operand.vmem [shape: f32[15,480], index: 7, kind: input, shape index: {}]   ;;  %s5098_s6 = inlined_call_operand.vmem [shape: f32[15,480], index: 6, kind: input, shape index: {}]   ;;  %s5099_s9 = inlined_call_operand.vmem [shape: f32[15,8], index: 9, kind: output, shape index: {1}]   ;;  %s5100_s8 = inlined_call_operand.vmem [shape: f32[15,8], index: 8, kind: output, shape index: {0}]  }
   0x1   :  { %v32_v0 = vld [vmem:[%s5091_s0] sm:$0xff]   ;;  %v36_v1 = vld [vmem:[%s5091_s0 + $0x10] sm:$0xff]   ;;  %v34_v2 = vld [vmem:[%s5091_s0 + $0x8] sm:$0xff]   ;;  %3358 = vset.pattern.permute.xlu0 %v3412_v3  ;;  %3359 = vset.pattern.permute.xlu1 %v3412_v3  ;;  %vm2408_vm3 = vcmask 64512   ;;  %vm2410_vm4 = vcmask 63488  }
   0x2   :  { %v3476_v4 = vld [vmem:[%s5091_s0 + $0x18] sm:$0xff]   ;;  %v3364_v5 = vld [vmem:[%s5092_s1] sm:$0xff]   ;;  %2908 = vmatprep.subr.bf16.mxu0 %v32_v0  ;;  %2920 = vmatprep.subr.bf16.mxu1 %v36_v1  ;;  %v3365_v7 = vld [vmem:[%s5092_s1 + $0x8] sm:$0xff]  }
   0x3   :  { %v40_v6 = vld [vmem:[%s5091_s0 + $0x20] sm:$0xff]   ;;  %2909 = vmatpush3.bf16.msra.mxu0 %v32_v0  ;;  %2921 = vmatpush3.bf16.msra.mxu1 %v36_v1  ;;  %v3492_v8 = vld [vmem:[%s5091_s0 + $0x30] sm:$0xff]   ;;  %v42_v9 = vld [vmem:[%s5091_s0 + $0x28] sm:$0xff]  }
   0x4   :  { %2910 = vmatprep.subr.bf16.mxu0 %v34_v2  ;;  %2922 = vmatprep.subr.bf16.mxu1 %v3476_v4  ;;  %v3501_v10 = vld [vmem:[%s5091_s0 + $0x38] sm:$0xff]   ;;  %v3367_v11 = vld [vmem:[%s5092_s1 + $0x10] sm:$0xff]   ;;  %v96_v12 = vld [vmem:[%s5094_s3] sm:$0xff] }
   0x5   :  { %2912 = vmatprep.mubr.msk.bf16.mxu0 %vm144_vm0, %v3364_v5  ;;  %2924 = vmatprep.mubr.msk.bf16.mxu1 %vm144_vm0, %v3364_v5  ;;  %v98_v13 = vld [vmem:[%s5094_s3 + $0x10] sm:$0xff]  ;;  %v3368_v14 = vld [vmem:[%s5092_s1 + $0x18] sm:$0xff]   ;;  %v97_v15 = vld [vmem:[%s5094_s3 + $0x8] sm:$0xff] }
   0x6   :  { %844 = vperm.xlu0 %3358, %v96_v12   ;;  %854 = vperm.xlu1 %3359, %v98_v13   ;;  %v99_v16 = vld [vmem:[%s5094_s3 + $0x18] sm:$0xff]  ;;  %v100_v17 = vld [vmem:[%s5094_s3 + $0x20] sm:$0xff]  ;;  %v101_v18 = vld [vmem:[%s5094_s3 + $0x28] sm:$0xff] }
   0x7   :  { %2911 = vmatpush3.bf16.msra.mxu0 %v34_v2  ;;  %2923 = vmatpush3.bf16.msra.mxu1 %v3476_v4  ;;  %v3545_v19 = vld [vmem:[%s5091_s0 + $0x40] sm:$0xff]   ;;  %v102_v20 = vld [vmem:[%s5094_s3 + $0x30] sm:$0xff]  ;;  %v103_v21 = vld [vmem:[%s5094_s3 + $0x38] sm:$0xff] }
   0x8   :  { %2932 = vmatprep.subr.bf16.mxu0 %v40_v6  ;;  %2944 = vmatprep.subr.bf16.mxu1 %v3492_v8  ;;  %5160 = vst [vmem:[#allocation2_spill] sm:$0xff] %v3545_v19  ;;  %v3372_v22 = vld [vmem:[%s5093_s2] sm:$0xff]   ;;  %v109_v24 = vld [vmem:[%s5095_s5 + $0x8] sm:$0xff]  ;;  %v110_v25 = vld [vmem:[%s5095_s5 + $0x10] sm:$0xff] }
   0x9   :  { %v108_v23 = vld [vmem:[%s5095_s5] sm:$0xff]  ;;  %v3373_v26 = vld [vmem:[%s5093_s2 + $0x8] sm:$0xff]   ;;  %v111_v27 = vld [vmem:[%s5095_s5 + $0x18] sm:$0xff] }
   0xa   :  { %2913 = vmatmul.mubr.msk.bf16.vlgmr.msra.gmra.mrb[0].mxu0 %vm144_vm0, %v3365_v7  ;;  %2925 = vmatmul.mubr.msk.bf16.vlgmr.msra.gmra.mrb[0].mxu1 %vm144_vm0, %v3365_v7  ;;  %v3584_v28 = vld [vmem:[%s5091_s0 + $0x48] sm:$0xff]   ;;  %v3374_v29 = vld [vmem:[%s5093_s2 + $0x10] sm:$0xff]   ;;  %v3375_v31 = vld [vmem:[%s5093_s2 + $0x18] sm:$0xff]  }
   0xb   :  { %2933 = vmatpush3.bf16.msra.mxu0 %v40_v6  ;;  %2916 = vmatprep.mubr.msk.bf16.mxu0 %vm144_vm0, %v3367_v11  ;;  %5161 = vst [vmem:[#allocation3_spill] sm:$0xff] %v3584_v28  ;;  %v52_v30 = vld [vmem:[%s5091_s0 + $0x50] sm:$0xff]   ;;  %v54_v32 = vld [vmem:[%s5091_s0 + $0x58] sm:$0xff]   ;;  %v3625_v33 = vld [vmem:[%s5096_s4] sm:$0xff]  }
   0xc   :  { %2928 = vmatprep.mubr.msk.bf16.mxu1 %vm144_vm0, %v3367_v11  ;;  %2934 = vmatprep.subr.bf16.mxu0 %v42_v9  ;;  %5162 = vst [vmem:[#allocation4_spill] sm:$0xff] %v3625_v33 }
   0xd   :  { %2945 = vmatpush3.bf16.msra.mxu1 %v3492_v8  ;;  %849 = vperm.xlu0 %3358, %v97_v15  }
   0xe   :  { %2946 = vmatprep.subr.bf16.mxu1 %v3501_v10  ;;  %859 = vperm.xlu1 %3359, %v99_v16  }
   0xf   :  { %2935 = vmatpush3.bf16.msra.mxu0 %v42_v9 }
  0x10   :  { %2956 = vmatprep.subr.bf16.mxu0 %v36_v1 }
  0x11   :  { %2947 = vmatpush3.bf16.msra.mxu1 %v3501_v10  ;;  %864 = vperm.xlu0 %3358, %v100_v17  }
  0x12   :  { %2917 = vmatmul.mubr.msk.bf16.gmra.mrb[4].mxu0 %vm144_vm0, %v3368_v14  ;;  %2968 = vmatprep.subr.bf16.mxu1 %v40_v6 }
  0x13   :  { %2929 = vmatmul.mubr.msk.bf16.gmra.mrb[4].mxu1 %vm144_vm0, %v3368_v14  ;;  %2936 = vmatprep.mubr.msk.bf16.mxu0 %vm144_vm0, %v3364_v5 }
  0x14   :  { %2948 = vmatprep.mubr.msk.bf16.mxu1 %vm144_vm0, %v3364_v5  ;;  %869 = vperm.xlu1 %3359, %v101_v18  }
  0x15   :  { %874 = vperm.xlu0 %3358, %v102_v20  }
  0x18   :  { %879 = vperm.xlu1 %3359, %v103_v21  }
  0x19   :  { %904 = vperm.xlu0 %3358, %v108_v23  }
  0x1a   :  { %2937 = vmatmul.mubr.msk.bf16.vlgmr.msra.gmra.mrb[8].mxu0 %vm144_vm0, %v3365_v7 }
  0x1b   :  { %2949 = vmatmul.mubr.msk.bf16.vlgmr.msra.gmra.mrb[8].mxu1 %vm144_vm0, %v3365_v7  ;;  %2957 = vmatpush3.bf16.msra.mxu0 %v36_v1 }
  0x1c   :  { %2940 = vmatprep.mubr.msk.bf16.mxu0 %vm144_vm0, %v3367_v11  ;;  %2952 = vmatprep.mubr.msk.bf16.mxu1 %vm144_vm0, %v3367_v11 }
  0x1d   :  { %2958 = vmatprep.subr.bf16.mxu0 %v3476_v4  ;;  %2969 = vmatpush3.bf16.msra.mxu1 %v40_v6 }
  0x1e   :  { %2970 = vmatprep.subr.bf16.mxu1 %v42_v9  ;;  %909 = vperm.xlu1 %3359, %v109_v24  }
  0x1f   :  { %2959 = vmatpush3.bf16.msra.mxu0 %v3476_v4  ;;  %914 = vperm.xlu0 %3358, %v110_v25  }
  0x20   :  { %2980 = vmatprep.subr.bf16.mxu0 %v3492_v8 }
  0x21   :  { %2971 = vmatpush3.bf16.msra.mxu1 %v42_v9 }
  0x22   :  { %2941 = vmatmul.mubr.msk.bf16.gmra.mrb[12].mxu0 %vm144_vm0, %v3368_v14  ;;  %2992 = vmatprep.subr.bf16.mxu1 %v3545_v19 }
  0x23   :  { %2953 = vmatmul.mubr.msk.bf16.gmra.mrb[12].mxu1 %vm144_vm0, %v3368_v14  ;;  %2960 = vmatprep.mubr.msk.bf16.mxu0 %vm144_vm0, %v3372_v22 }
  0x24   :  { %2972 = vmatprep.mubr.msk.bf16.mxu1 %vm144_vm0, %v3372_v22  ;;  %919 = vperm.xlu1 %3359, %v111_v27  }
  0x2a   :  { %2961 = vmatmul.mubr.msk.bf16.vlgmr.msra.gmra.mrb[16].mxu0 %vm144_vm0, %v3373_v26 }
  0x2b   :  { %2973 = vmatmul.mubr.msk.bf16.vlgmr.msra.gmra.mrb[16].mxu1 %vm144_vm0, %v3373_v26  ;;  %2981 = vmatpush3.bf16.msra.mxu0 %v3492_v8 }
  0x2c   :  { %2964 = vmatprep.mubr.msk.bf16.mxu0 %vm144_vm0, %v3374_v29  ;;  %2976 = vmatprep.mubr.msk.bf16.mxu1 %vm144_vm0, %v3374_v29 }
  0x2d   :  { %2982 = vmatprep.subr.bf16.mxu0 %v3501_v10  ;;  %2993 = vmatpush3.bf16.msra.mxu1 %v3545_v19 }
  0x2e   :  { %2994 = vmatprep.subr.bf16.mxu1 %v3584_v28 }
  0x2f   :  { %2983 = vmatpush3.bf16.msra.mxu0 %v3501_v10 }
  0x30   :  { %3004 = vmatprep.subr.bf16.mxu0 %v52_v30 }
  0x31   :  { %2995 = vmatpush3.bf16.msra.mxu1 %v3584_v28 }
  0x32   :  { %2965 = vmatmul.mubr.msk.bf16.gmra.mrb[20].mxu0 %vm144_vm0, %v3375_v31 }
  0x33   :  { %2977 = vmatmul.mubr.msk.bf16.gmra.mrb[20].mxu1 %vm144_vm0, %v3375_v31  ;;  %2984 = vmatprep.mubr.msk.bf16.mxu0 %vm144_vm0, %v3372_v22 }
  0x34   :  { %2996 = vmatprep.mubr.msk.bf16.mxu1 %vm144_vm0, %v3372_v22 }
  0x3a   :  { %2985 = vmatmul.mubr.msk.bf16.vlgmr.msra.gmra.mrb[24].mxu0 %vm144_vm0, %v3373_v26 }
  0x3b   :  { %2997 = vmatmul.mubr.msk.bf16.vlgmr.msra.gmra.mrb[24].mxu1 %vm144_vm0, %v3373_v26  ;;  %3005 = vmatpush3.bf16.msra.mxu0 %v52_v30 }
  0x3c   :  { %2988 = vmatprep.mubr.msk.bf16.mxu0 %vm144_vm0, %v3374_v29  ;;  %3000 = vmatprep.mubr.msk.bf16.mxu1 %vm144_vm0, %v3374_v29 }
  0x3d   :  { %3006 = vmatprep.subr.bf16.mxu0 %v54_v32 }
  0x3f   :  { %3007 = vmatpush3.bf16.msra.mxu0 %v54_v32 }
  0x42   :  { %2989 = vmatmul.mubr.msk.bf16.gmra.mrb[28].mxu0 %vm144_vm0, %v3375_v31 }
  0x43   :  { %3001 = vmatmul.mubr.msk.bf16.gmra.mrb[28].mxu1 %vm144_vm0, %v3375_v31  ;;  %3008 = vmatprep.mubr.msk.bf16.mxu0 %vm144_vm0, %v3372_v22 }
  0x44   :  { %3024 = vmatprep.mubr.msk.bf16.mxu1 %vm932_vm1, %v3625_v33 }
  0x4a   :  { %3009 = vmatmul.mubr.msk.bf16.vlgmr.msra.gmra.mrb[32].mxu0 %vm144_vm0, %v3373_v26 }
  0x4b   :  { %3012 = vmatprep.mubr.msk.bf16.mxu0 %vm144_vm0, %v3374_v29 }
  0x52   :  { %3013 = vmatmul.mubr.msk.bf16.gmra.mrb[36].mxu0 %vm144_vm0, %v3375_v31 }
  0x53   :  { %3036 = vmatprep.mubr.msk.bf16.mxu0 %vm932_vm1, %v3625_v33 }
  0x85   :  { %v3663_v50 = vpop.permute.xlu0 %844  ;;  %v3681_v59 = vpop.permute.xlu1 %854 }
  0x8c   :  { %v3683_v60 = vpop.permute.xlu0 %849 }
  0x8d   :  { %v3701_v5 = vpop.permute.xlu1 %859 }
  0x90   :  { %v3703_v6 = vpop.permute.xlu0 %864 }
  0x91   :  { %5189 = vst [vmem:[#allocation31_spill] sm:$0xff] %v3703_v6 }
  0xdd   :  { %v3631_v34 = vpop.f32.mrb[0].mxu0  ;;  %v3635_v36 = vpop.f32.mrb[0].mxu1 }
  0xde   :  { %v3633_v35 = vpop.f32.mrb[1].mxu0  ;;  %5163 = vst [vmem:[#allocation5_spill] sm:$0xff] %v3635_v36  ;;  %v3639_v38 = vpop.f32.mrb[1].mxu1 }
  0xdf   :  { %v3637_v37 = vpop.f32.mrb[2].mxu0  ;;  %5164 = vst [vmem:[#allocation6_spill] sm:$0xff] %v3639_v38  ;;  %v3643_v40 = vpop.f32.mrb[2].mxu1 }
  0xe0   :  { %v3641_v39 = vpop.f32.mrb[3].mxu0  ;;  %5165 = vst [vmem:[#allocation7_spill] sm:$0xff] %v3643_v40  ;;  %v3645_v41 = vpop.f32.mrb[3].mxu1 }
  0xe1   :  { %5166 = vst [vmem:[#allocation8_spill] sm:$0xff] %v3645_v41 }
  0xe5   :  { %v3647_v42 = vpop.f32.mrb[4].mxu0 }
  0xe6   :  { %v3649_v43 = vpop.f32.mrb[5].mxu0  ;;  %v3651_v44 = vpop.f32.mrb[4].mxu1 }
  0xe7   :  { %5167 = vst [vmem:[#allocation9_spill] sm:$0xff] %v3651_v44  ;;  %v3653_v45 = vpop.f32.mrb[6].mxu0  ;;  %v3655_v46 = vpop.f32.mrb[5].mxu1 }
  0xe8   :  { %5168 = vst [vmem:[#allocation10_spill] sm:$0xff] %v3653_v45  ;;  %5169 = vst [vmem:[#allocation11_spill] sm:$0xff] %v3655_v46  ;;  %v3657_v47 = vpop.f32.mrb[7].mxu0  ;;  %v3659_v48 = vpop.f32.mrb[6].mxu1 }
  0xe9   :  { %5170 = vst [vmem:[#allocation12_spill] sm:$0xff] %v3657_v47  ;;  %5171 = vst [vmem:[#allocation13_spill] sm:$0xff] %v3659_v48  ;;  %v3661_v49 = vpop.f32.mrb[7].mxu1 }
  0xea   :  { %5172 = vst [vmem:[#allocation14_spill] sm:$0xff] %v3661_v49 }
  0xed   :  { %v3665_v51 = vpop.f32.mrb[8].mxu0 }
  0xee   :  { %5173 = vst [vmem:[#allocation15_spill] sm:$0xff] %v3665_v51  ;;  %v3667_v52 = vpop.f32.mrb[9].mxu0  ;;  %v3669_v53 = vpop.f32.mrb[8].mxu1 }
  0xef   :  { %5174 = vst [vmem:[#allocation16_spill] sm:$0xff] %v3667_v52  ;;  %5175 = vst [vmem:[#allocation17_spill] sm:$0xff] %v3669_v53  ;;  %v3671_v54 = vpop.f32.mrb[10].mxu0  ;;  %v3673_v55 = vpop.f32.mrb[9].mxu1 }
  0xf0   :  { %5176 = vst [vmem:[#allocation18_spill] sm:$0xff] %v3671_v54  ;;  %5177 = vst [vmem:[#allocation19_spill] sm:$0xff] %v3673_v55  ;;  %v3675_v56 = vpop.f32.mrb[11].mxu0  ;;  %v3677_v57 = vpop.f32.mrb[10].mxu1 }
  0xf1   :  { %5178 = vst [vmem:[#allocation20_spill] sm:$0xff] %v3675_v56  ;;  %5179 = vst [vmem:[#allocation21_spill] sm:$0xff] %v3677_v57  ;;  %v3679_v58 = vpop.f32.mrb[11].mxu1 }
  0xf2   :  { %5180 = vst [vmem:[#allocation22_spill] sm:$0xff] %v3679_v58 }
  0xf5   :  { %v3685_v61 = vpop.f32.mrb[12].mxu0 }
  0xf6   :  { %5181 = vst [vmem:[#allocation23_spill] sm:$0xff] %v3685_v61  ;;  %v3687_v62 = vpop.f32.mrb[13].mxu0  ;;  %v3689_v63 = vpop.f32.mrb[12].mxu1 }
  0xf7   :  { %5182 = vst [vmem:[#allocation24_spill] sm:$0xff] %v3687_v62  ;;  %5183 = vst [vmem:[#allocation25_spill] sm:$0xff] %v3689_v63  ;;  %v3691_v0 = vpop.f32.mrb[14].mxu0  ;;  %v3693_v1 = vpop.f32.mrb[13].mxu1 }
  0xf8   :  { %5184 = vst [vmem:[#allocation26_spill] sm:$0xff] %v3691_v0  ;;  %5185 = vst [vmem:[#allocation27_spill] sm:$0xff] %v3693_v1  ;;  %v3695_v2 = vpop.f32.mrb[15].mxu0  ;;  %v3697_v3 = vpop.f32.mrb[14].mxu1 }
  0xf9   :  { %5186 = vst [vmem:[#allocation28_spill] sm:$0xff] %v3695_v2  ;;  %5187 = vst [vmem:[#allocation29_spill] sm:$0xff] %v3697_v3  ;;  %v3699_v4 = vpop.f32.mrb[15].mxu1 }
  0xfa   :  { %5188 = vst [vmem:[#allocation30_spill] sm:$0xff] %v3699_v4 }
  0xfd   :  { %v2962_v7 = vpop.f32.mrb[16].mxu0 }
  0xfe   :  { %v836_v8 = vadd.f32 %v2962_v7, %v3631_v34  ;;  %v2974_v9 = vpop.f32.mrb[16].mxu1  ;;  %v519_v10 = vpop.f32.mrb[17].mxu0 }
  0xff   :  { %v998_v11 = vadd.f32 %v2974_v9, %v3631_v34  ;;  %v1338_v12 = vadd.f32 %v2974_v9, %v3635_v36  ;;  %v834_v13 = vadd.f32 %v519_v10, %v3633_v35  ;;  %v584_v14 = vpop.f32.mrb[17].mxu1  ;;  %v2963_v15 = vpop.f32.mrb[18].mxu0 }
 0x100   :  { %v884_v16 = vadd.f32 %v3681_v59, %v836_v8  ;;  %v996_v17 = vadd.f32 %v584_v14, %v3633_v35  ;;  %v1336_v18 = vadd.f32 %v584_v14, %v3639_v38  ;;  %v837_v20 = vadd.f32 %v2963_v15, %v3637_v37  ;;  %v2975_v21 = vpop.f32.mrb[18].mxu1  ;;  %v522_v22 = vpop.f32.mrb[19].mxu0 }
 0x101   :  { %v3714_v23 = vadd.f32 %v998_v11, %v3681_v59  ;;  %v3717_v24 = vadd.f32 %v1338_v12, %v3681_v59  ;;  %v3720_v25 = vadd.f32 %v3663_v50, %v834_v13  ;;  %v999_v26 = vadd.f32 %v2975_v21, %v3637_v37  ;;  %v587_v27 = vpop.f32.mrb[19].mxu1  ;;  %v3731_v8 = vpop.permute.xlu1 %869 }
 0x102   :  { %v3724_v29 = vadd.f32 %v996_v17, %v3663_v50  ;;  %v885_v30 = vadd.f32 %v3701_v5, %v837_v20  ;;  %v892_v31 = vmax.f32 %v884_v16, 0.0  ;;  %v3729_v7 = vadd.f32 %v1336_v18, %v3663_v50  ;;  %5192 = vst [vmem:[#allocation34_spill] sm:$0xff] %v3731_v8  ;;  %v3736_v13 = vpop.permute.xlu0 %874 }
 0x103   :  { %5190 = vst [vmem:[#allocation32_spill] sm:$0xff] %v3717_v24  ;;  %v1339_v12 = vadd.f32 %v2975_v21, %v3643_v40  ;;  %5193 = vst [vmem:[#allocation35_spill] sm:$0xff] %v3736_v13  ;;  %v3739_v14 = vadd.f32 %v999_v26, %v3701_v5  ;;  %v835_v15 = vadd.f32 %v522_v22, %v3641_v39 }
 0x104   :  { %5191 = vst [vmem:[#allocation33_spill] sm:$0xff] %v3729_v7  ;;  %v893_v11 = vmax.f32 %v885_v30, 0.0  ;;  %v997_v16 = vadd.f32 %v587_v27, %v3641_v39  ;;  %v1337_v17 = vadd.f32 %v587_v27, %v3645_v41  ;;  %v1012_v20 = vmax.f32 %v3724_v29, 0.0 }
 0x105   :  { %v2966_v18 = vpop.f32.mrb[20].mxu0  ;;  %v3746_v9 = vadd.f32 %v1339_v12, %v3701_v5  ;;  %v883_v26 = vadd.f32 %v3683_v60, %v835_v15 }
 0x106   :  { %v840_v30 = vadd.f32 %v2966_v18, %v3647_v42  ;;  %v2978_v21 = vpop.f32.mrb[20].mxu1  ;;  %v535_v32 = vpop.f32.mrb[21].mxu0  ;;  %v3749_v10 = vpack.c.bf16 %v893_v11, %v892_v31  ;;  %v1005_v22 = vadd.f32 %v997_v16, %v3683_v60  ;;  %v3754_v28 = vadd.f32 %v1337_v17, %v3683_v60 }
 0x107   :  { %5194 = vst [vmem:[#allocation36_spill] sm:$0xff] %v3746_v9  ;;  %v1002_v27 = vadd.f32 %v2978_v21, %v3647_v42  ;;  %v600_v19 = vpop.f32.mrb[21].mxu1  ;;  %v2967_v29 = vpop.f32.mrb[22].mxu0  ;;  %v1342_v18 = vadd.f32 %v2978_v21, %v3651_v44  ;;  %v838_v31 = vadd.f32 %v535_v32, %v3649_v43  ;;  %v1015_v16 = vmax.f32 %v3739_v14, 0.0 }
 0x108   :  { %5195 = vst [vmem:[#allocation37_spill] sm:$0xff] %v3754_v28  ;;  %v3759_v24 = vadd.f32 %v3736_v13, %v840_v30  ;;  %v2979_v11 = vpop.f32.mrb[22].mxu1  ;;  %v538_v15 = vpop.f32.mrb[23].mxu0  ;;  %v891_v33 = vmax.f32 %v883_v26, 0.0  ;;  %v1013_v3 = vmax.f32 %v1005_v22, 0.0  ;;  %v1000_v21 = vadd.f32 %v600_v19, %v3649_v43 }
 0x109   :  { %v3766_v4 = vadd.f32 %v1002_v27, %v3736_v13  ;;  %v603_v2 = vpop.f32.mrb[23].mxu1  ;;  %v3770_v30 = vadd.f32 %v1342_v18, %v3736_v13  ;;  %v3774_v32 = vadd.f32 %v3703_v6, %v838_v31  ;;  %v1340_v14 = vadd.f32 %v600_v19, %v3655_v46  ;;  %v3779_v27 = vpop.permute.xlu1 %879 }
 0x10a   :  { %v841_v17 = vadd.f32 %v2967_v29, %v3653_v45  ;;  %v1003_v26 = vadd.f32 %v2979_v11, %v3653_v45  ;;  %5197 = vst [vmem:[#allocation39_spill] sm:$0xff] %v3779_v27  ;;  %v3784_v18 = vadd.f32 %v1000_v21, %v3703_v6  ;;  %v1343_v9 = vadd.f32 %v2979_v11, %v3659_v48 }
 0x10b   :  { %5196 = vst [vmem:[#allocation38_spill] sm:$0xff] %v3770_v30  ;;  %v3788_v31 = vadd.f32 %v1340_v14, %v3703_v6  ;;  %v839_v28 = vadd.f32 %v538_v15, %v3657_v47  ;;  %v1001_v21 = vadd.f32 %v603_v2, %v3657_v47  ;;  %v1341_v11 = vadd.f32 %v603_v2, %v3661_v49 }
 0x10c   :  { %v3791_v19 = vadd.f32 %v3779_v27, %v841_v17  ;;  %v3794_v29 = vadd.f32 %v1003_v26, %v3779_v27  ;;  %v3799_v12 = vadd.f32 %v1343_v9, %v3779_v27  ;;  %v5199_v49 = vmax.f32 %v3720_v25, 0.0 }
 0x10d   :  { %5198 = vst [vmem:[#allocation40_spill] sm:$0xff] %v3788_v31  ;;  %v2986_v7 = vpop.f32.mrb[24].mxu0  ;;  %v3807_v15 = vadd.f32 %v3731_v8, %v839_v28  ;;  %v3811_v30 = vadd.f32 %v1001_v21, %v3731_v8  ;;  %v3814_v2 = vadd.f32 %v1341_v11, %v3731_v8  ;;  %v1020_v31 = vpack.c.bf16 %v1013_v3, %v1012_v20 }
 0x10e   :  { %v2998_v14 = vpop.f32.mrb[24].mxu1  ;;  %v649_v0 = vpop.f32.mrb[25].mxu0  ;;  %v898_v17 = vpack.c.bf16 %v891_v33, %v5199_v49  ;;  %v5200_v28 = vmax.f32 %v3714_v23, 0.0  ;;  %v1083_v1 = vadd.f32 %v2986_v7, %v3631_v34  ;;  %v1423_v11 = vadd.f32 %v2986_v7, %v3635_v36 }
 0x10f   :  { %v726_v45 = vpop.f32.mrb[25].mxu1  ;;  %v2987_v22 = vpop.f32.mrb[26].mxu0  ;;  %v895_v6 = vmax.f32 %v3807_v15, 0.0  ;;  %v1678_v33 = vadd.f32 %v2986_v7, %v3665_v51  ;;  %v1017_v49 = vmax.f32 %v3811_v30, 0.0  ;;  %3028 = vmatprep.subr.bf16.mxu0 %v1020_v31  ;;  %v3831_v23 = vadd.f32 %v2998_v14, %v3631_v34 }
 0x110   :  { %v2999_v47 = vpop.f32.mrb[26].mxu1  ;;  %v652_v48 = vpop.f32.mrb[27].mxu0  ;;  %v1021_v27 = vpack.c.bf16 %v1015_v16, %v5200_v28  ;;  %3016 = vmatprep.subr.bf16.mxu1 %v898_v17  ;;  %v3828_v3 = vadd.f32 %v1083_v1, %v3681_v59  ;;  %v3834_v25 = vadd.f32 %v2998_v14, %v3635_v36  ;;  %3029 = vmatpush3.bf16.msra.mxu0 %v1020_v31 }
 0x111   :  { %v729_v9 = vpop.f32.mrb[27].mxu1  ;;  %3017 = vmatpush3.bf16.msra.mxu1 %v898_v17  ;;  %v3839_v7 = vadd.f32 %v1423_v11, %v3681_v59  ;;  %v3842_v16 = vadd.f32 %v1678_v33, %v3681_v59  ;;  %v3845_v1 = vadd.f32 %v2998_v14, %v3665_v51  ;;  %v3848_v30 = vadd.f32 %v2998_v14, %v3669_v53 }
 0x112   :  { %3018 = vmatprep.subr.bf16.mxu1 %v3749_v10  ;;  %3030 = vmatprep.subr.bf16.mxu0 %v1021_v27  ;;  %v1081_v17 = vadd.f32 %v649_v0, %v3633_v35  ;;  %v1421_v15 = vadd.f32 %v649_v0, %v3639_v38  ;;  %v1676_v31 = vadd.f32 %v649_v0, %v3667_v52 }
 0x113   :  { %5201 = vst [vmem:[#allocation41_spill] sm:$0xff] %v3842_v16  ;;  %5202 = vst [vmem:[#allocation42_spill] sm:$0xff] %v3845_v1  ;;  %v3854_v11 = vadd.f32 %v726_v45, %v3633_v35  ;;  %v3857_v33 = vadd.f32 %v726_v45, %v3639_v38  ;;  %v3860_v21 = vadd.f32 %v726_v45, %v3667_v52 }
 0x114   :  { %5203 = vst [vmem:[#allocation43_spill] sm:$0xff] %v3848_v30  ;;  %v3863_v20 = vadd.f32 %v726_v45, %v3673_v55  ;;  %v3866_v53 = vadd.f32 %v1081_v17, %v3663_v50  ;;  %v3869_v0 = vadd.f32 %v1421_v15, %v3663_v50  ;;  %v3872_v30 = vadd.f32 %v1676_v31, %v3663_v50 }
 0x115   :  { %v2990_v28 = vpop.f32.mrb[28].mxu0  ;;  %5204 = vst [vmem:[#allocation44_spill] sm:$0xff] %v3860_v21  ;;  %3019 = vmatpush3.bf16.msra.mxu1 %v3749_v10  ;;  %v1084_v51 = vadd.f32 %v2987_v22, %v3637_v37  ;;  %3031 = vmatpush3.bf16.msra.mxu0 %v1021_v27  ;;  %v1424_v45 = vadd.f32 %v2987_v22, %v3643_v40 }
 0x116   :  { %5205 = vst [vmem:[#allocation45_spill] sm:$0xff] %v3863_v20  ;;  %v3002_v14 = vpop.f32.mrb[28].mxu1  ;;  %v665_v26 = vpop.f32.mrb[29].mxu0  ;;  %5206 = vst [vmem:[#allocation46_spill] sm:$0xff] %v3872_v30  ;;  %v1679_v55 = vadd.f32 %v2987_v22, %v3671_v54  ;;  %v3881_v17 = vadd.f32 %v2999_v47, %v3637_v37  ;;  %v3884_v15 = vadd.f32 %v2999_v47, %v3643_v40 }
 0x117   :  { %v742_v1 = vpop.f32.mrb[29].mxu1  ;;  %v3876_v52 = vpop.f32.mrb[30].mxu0  ;;  %v3891_v10 = vadd.f32 %v1084_v51, %v3701_v5  ;;  %v3894_v21 = vadd.f32 %v2999_v47, %v3671_v54  ;;  %v3897_v27 = vadd.f32 %v2999_v47, %v3677_v57  ;;  %v1082_v22 = vadd.f32 %v652_v48, %v3641_v39 }
 0x118   :  { %5207 = vst [vmem:[#allocation47_spill] sm:$0xff] %v3884_v15  ;;  %v3886_v31 = vpop.f32.mrb[30].mxu1  ;;  %v3888_v20 = vpop.f32.mrb[31].mxu0  ;;  %v3903_v40 = vadd.f32 %v1424_v45, %v3701_v5  ;;  %v3906_v36 = vadd.f32 %v1679_v55, %v3701_v5  ;;  %v1422_v30 = vadd.f32 %v652_v48, %v3645_v41  ;;  %v1677_v51 = vadd.f32 %v652_v48, %v3675_v56 }
 0x119   :  { %5208 = vst [vmem:[#allocation48_spill] sm:$0xff] %v3894_v21  ;;  %5209 = vst [vmem:[#allocation49_spill] sm:$0xff] %v3897_v27  ;;  %v3900_v16 = vpop.f32.mrb[31].mxu1  ;;  %v3911_v54 = vadd.f32 %v1082_v22, %v3683_v60  ;;  %v3914_v47 = vadd.f32 %v729_v9, %v3641_v39  ;;  %v3917_v57 = vadd.f32 %v729_v9, %v3645_v41  ;;  %v5214_v22 = vmax.f32 %v3774_v32, 0.0 }
 0x11a   :  { %5210 = vst [vmem:[#allocation50_spill] sm:$0xff] %v3906_v36  ;;  %v3920_v27 = vadd.f32 %v729_v9, %v3675_v56  ;;  %v3923_v45 = vadd.f32 %v1422_v30, %v3683_v60  ;;  %v3926_v55 = vadd.f32 %v1677_v51, %v3683_v60  ;;  %v3929_v48 = vadd.f32 %v729_v9, %v3679_v58 }
 0x11b   :  { %v900_v21 = vpack.c.bf16 %v895_v6, %v5214_v22  ;;  %v5215_v36 = vmax.f32 %v3784_v18, 0.0  ;;  %v5216_v41 = vmax.f32 %v3759_v24, 0.0  ;;  %v5217_v56 = vmax.f32 %v3791_v19, 0.0 }
 0x11c   :  { %5211 = vst [vmem:[#allocation51_spill] sm:$0xff] %v3920_v27  ;;  %5212 = vst [vmem:[#allocation52_spill] sm:$0xff] %v3926_v55  ;;  %v5218_v30 = vmax.f32 %v3766_v4, 0.0  ;;  %v5219_v15 = vmax.f32 %v3794_v29, 0.0  ;;  %v1087_v55 = vadd.f32 %v2990_v28, %v3647_v42  ;;  %v1427_v6 = vadd.f32 %v2990_v28, %v3651_v44 }
 0x11d   :  { %5213 = vst [vmem:[#allocation53_spill] sm:$0xff] %v3929_v48  ;;  %v1022_v38 = vpack.c.bf16 %v1017_v49, %v5215_v36  ;;  %v901_v27 = vpack.c.bf16 %v5217_v56, %v5216_v41  ;;  %v3944_v9 = vpop.f32.mrb[32].mxu0  ;;  %3020 = vmatprep.subr.bf16.mxu1 %v900_v21  ;;  %v1682_v32 = vadd.f32 %v2990_v28, %v3685_v61  ;;  %v1097_v19 = vmax.f32 %v3866_v53, 0.0 }
 0x11e   :  { %v1023_v51 = vpack.c.bf16 %v5219_v15, %v5218_v30  ;;  %v3949_v36 = vadd.f32 %v3002_v14, %v3647_v42  ;;  %v3952_v24 = vadd.f32 %v3002_v14, %v3651_v44  ;;  %v3954_v41 = vpop.f32.mrb[33].mxu0  ;;  %3021 = vmatpush3.bf16.msra.mxu1 %v900_v21  ;;  %v3957_v56 = vadd.f32 %v1087_v55, %v3736_v13  ;;  %v5226_v30 = vld [vmem:[#allocation31_spill] sm:$0xff] }
 0x11f   :  { %3032 = vmatprep.subr.bf16.mxu0 %v1022_v38  ;;  %v3960_v4 = vadd.f32 %v3002_v14, %v3685_v61  ;;  %v3963_v18 = vadd.f32 %v3002_v14, %v3689_v63  ;;  %v3966_v29 = vpop.f32.mrb[34].mxu0  ;;  %3022 = vmatprep.subr.bf16.mxu1 %v901_v27  ;;  %v3969_v49 = vadd.f32 %v1427_v6, %v3736_v13  ;;  %v1098_v15 = vmax.f32 %v3911_v54, 0.0  ;;  %v5228_v63 = vld [vmem:[#allocation27_spill] sm:$0xff]  ;;  %v5230_v54 = vld [vmem:[#allocation10_spill] sm:$0xff] }
 0x120   :  { %5220 = vst [vmem:[#allocation54_spill] sm:$0xff] %v3952_v24  ;;  %3033 = vmatpush3.bf16.msra.mxu0 %v1022_v38  ;;  %v3972_v21 = vadd.f32 %v1682_v32, %v3736_v13  ;;  %v1085_v28 = vadd.f32 %v665_v26, %v3649_v43  ;;  %v3976_v55 = vpop.f32.mrb[35].mxu0  ;;  %v1425_v14 = vadd.f32 %v665_v26, %v3655_v46 }
 0x121   :  { %5221 = vst [vmem:[#allocation55_spill] sm:$0xff] %v3960_v4  ;;  %5222 = vst [vmem:[#allocation56_spill] sm:$0xff] %v3963_v18  ;;  %3034 = vmatprep.subr.bf16.mxu0 %v1023_v51  ;;  %v1680_v53 = vadd.f32 %v665_v26, %v3687_v62  ;;  %v1170_v38 = vadd.f32 %v742_v1, %v3649_v43  ;;  %v3982_v22 = vadd.f32 %v742_v1, %v3655_v46  ;;  %v3996_v26 = vld [vmem:[%s5096_s4 + $0x8] sm:$0xff]  }
 0x122   :  { %5223 = vst [vmem:[#allocation57_spill] sm:$0xff] %v3969_v49  ;;  %5224 = vst [vmem:[#allocation58_spill] sm:$0xff] %v3972_v21  ;;  %v1093_v6 = vadd.f32 %v1085_v28, %v5226_v30  ;;  %v3986_v32 = vadd.f32 %v742_v1, %v3687_v62  ;;  %v3989_v18 = vadd.f32 %v742_v1, %v5228_v63  ;;  %3023 = vmatpush3.bf16.msra.mxu1 %v901_v27  ;;  %v5233_v28 = vld [vmem:[#allocation13_spill] sm:$0xff]  ;;  %v5234_v1 = vld [vmem:[#allocation26_spill] sm:$0xff] }
 0x123   :  { %5225 = vst [vmem:[#allocation59_spill] sm:$0xff] %v3982_v22  ;;  %v1088_v58 = vadd.f32 %v3876_v52, %v5230_v54  ;;  %v3999_v48 = vadd.f32 %v1425_v14, %v5226_v30  ;;  %v4002_v61 = vadd.f32 %v1680_v53, %v5226_v30  ;;  %v1428_v4 = vadd.f32 %v3876_v52, %v5233_v28 }
 0x124   :  { %5227 = vst [vmem:[#allocation60_spill] sm:$0xff] %v3986_v32  ;;  %5229 = vst [vmem:[#allocation61_spill] sm:$0xff] %v3989_v18  ;;  %v1683_v63 = vadd.f32 %v3876_v52, %v5234_v1  ;;  %3035 = vmatpush3.bf16.msra.mxu0 %v1023_v51  ;;  %v5235_v18 = vld [vmem:[#allocation39_spill] sm:$0xff]  ;;  %v1173_v32 = vadd.f32 %v3886_v31, %v5230_v54  ;;  %v4013_v14 = vadd.f32 %v3886_v31, %v5233_v28  ;;  %v5240_v52 = vld [vmem:[#allocation29_spill] sm:$0xff] }
 0x125   :  { %5231 = vst [vmem:[#allocation10_spill] sm:$0xff] %v3999_v48  ;;  %5232 = vst [vmem:[#allocation62_spill] sm:$0xff] %v4002_v61  ;;  %v1096_v62 = vadd.f32 %v1088_v58, %v5235_v18  ;;  %v4017_v53 = vadd.f32 %v3886_v31, %v5234_v1  ;;  %v4020_v27 = vadd.f32 %v1428_v4, %v5235_v18  ;;  %v5242_v51 = vld [vmem:[#allocation12_spill] sm:$0xff]  ;;  %v4031_v61 = vpop.f32.mrb[36].mxu0  ;;  %v5243_v28 = vld [vmem:[#allocation14_spill] sm:$0xff]  ;;  %3025 = vmatmul.mubr.msk.bf16.vlgmr.msra.gmra.mrb[32].mxu1 %vm932_vm1, %v3996_v26 }
 0x126   :  { %5236 = vst [vmem:[#allocation63_spill] sm:$0xff] %v4013_v14  ;;  %v4023_v21 = vadd.f32 %v1683_v63, %v5235_v18  ;;  %v4027_v58 = vadd.f32 %v3886_v31, %v5240_v52  ;;  %v1086_v44 = vadd.f32 %v3888_v20, %v5242_v51  ;;  %v1426_v46 = vadd.f32 %v3888_v20, %v5243_v28  ;;  %v5244_v1 = vld [vmem:[#allocation28_spill] sm:$0xff]  ;;  %v4045_v31 = vpop.f32.mrb[37].mxu0 }
 0x127   :  { %5237 = vst [vmem:[#allocation64_spill] sm:$0xff] %v4017_v53  ;;  %5238 = vst [vmem:[#allocation65_spill] sm:$0xff] %v4020_v27  ;;  %v1681_v53 = vadd.f32 %v3888_v20, %v5244_v1  ;;  %v1171_v4 = vadd.f32 %v3900_v16, %v5242_v51  ;;  %v4041_v63 = vadd.f32 %v3900_v16, %v5243_v28  ;;  %3037 = vmatmul.mubr.msk.bf16.vlgmr.msra.gmra.mrb[40].mxu0 %vm932_vm1, %v3996_v26  ;;  %v4058_v14 = vpop.f32.mrb[38].mxu0 }
 0x128   :  { %5239 = vst [vmem:[#allocation66_spill] sm:$0xff] %v4023_v21  ;;  %5241 = vst [vmem:[#allocation67_spill] sm:$0xff] %v4027_v58  ;;  %v1094_v52 = vadd.f32 %v1086_v44, %v3731_v8  ;;  %v4050_v58 = vadd.f32 %v3900_v16, %v5244_v1  ;;  %v5247_v21 = vld [vmem:[#allocation30_spill] sm:$0xff]  ;;  %v1105_v28 = vpack.c.bf16 %v1098_v15, %v1097_v19  ;;  %v1099_v19 = vmax.f32 %v3828_v3, 0.0 }
 0x129   :  { %5245 = vst [vmem:[#allocation12_spill] sm:$0xff] %v4041_v63  ;;  %v4054_v20 = vadd.f32 %v3900_v16, %v5247_v21  ;;  %5249 = vst [vmem:[#allocation70_spill] sm:$0xff] %v4058_v14  ;;  %v4061_v24 = vadd.f32 %v1426_v46, %v3731_v8  ;;  %v4064_v27 = vadd.f32 %v1681_v53, %v3731_v8  ;;  %v4070_v16 = vpop.f32.mrb[39].mxu0  ;;  %v5253_v21 = vld [vmem:[#allocation4_spill] sm:$0xff]  ;;  %v1100_v46 = vmax.f32 %v3891_v10, 0.0 }
 0x12a   :  { %5246 = vst [vmem:[#allocation68_spill] sm:$0xff] %v4050_v58  ;;  %v1174_v44 = vadd.f32 %v3854_v11, %v3663_v50  ;;  %v1175_v1 = vadd.f32 %v3914_v47, %v3683_v60  ;;  %5252 = vst [vmem:[#allocation73_spill] sm:$0xff] %v4070_v16  ;;  %3048 = vmatprep.mubr.msk.bf16.mxu1 %vm932_vm1, %v5253_v21  ;;  %3040 = vmatprep.subr.bf16.mxu1 %v1105_v28  ;;  %v1102_v58 = vmax.f32 %v1094_v52, 0.0  ;;  %v5254_v52 = vld [vmem:[#allocation33_spill] sm:$0xff] }
 0x12b   :  { %5248 = vst [vmem:[#allocation69_spill] sm:$0xff] %v4054_v20  ;;  %5250 = vst [vmem:[#allocation71_spill] sm:$0xff] %v4061_v24  ;;  %v1176_v15 = vadd.f32 %v3831_v23, %v3681_v59  ;;  %v1177_v53 = vadd.f32 %v3881_v17, %v3701_v5  ;;  %3060 = vmatprep.mubr.msk.bf16.mxu0 %vm932_vm1, %v5253_v21  ;;  %3041 = vmatpush3.bf16.msra.mxu1 %v1105_v28  ;;  %v1101_v20 = vmax.f32 %v1093_v6, 0.0 }
 0x12c   :  { %5251 = vst [vmem:[#allocation72_spill] sm:$0xff] %v4064_v27  ;;  %v1182_v11 = vmax.f32 %v1174_v44, 0.0  ;;  %v1183_v47 = vmax.f32 %v1175_v1, 0.0  ;;  %v1106_v27 = vpack.c.bf16 %v1100_v46, %v1099_v19  ;;  %v1178_v3 = vadd.f32 %v1170_v38, %v5226_v30  ;;  %v5256_v44 = vld [vmem:[#allocation37_spill] sm:$0xff] }
 0x12d   :  { %v1184_v49 = vmax.f32 %v1176_v15, 0.0  ;;  %v1185_v63 = vmax.f32 %v1177_v53, 0.0  ;;  %v1107_v22 = vpack.c.bf16 %v1102_v58, %v1101_v20  ;;  %v1179_v23 = vadd.f32 %v1171_v4, %v3731_v8  ;;  %v5260_v15 = vld [vmem:[#allocation36_spill] sm:$0xff] }
 0x12e   :  { %v1190_v10 = vpack.c.bf16 %v1183_v47, %v1182_v11  ;;  %v1103_v24 = vmax.f32 %v3957_v56, 0.0  ;;  %3042 = vmatprep.subr.bf16.mxu1 %v1106_v27  ;;  %v1186_v48 = vmax.f32 %v1178_v3, 0.0  ;;  %v1104_v21 = vmax.f32 %v1096_v62, 0.0  ;;  %v5262_v11 = vld [vmem:[#allocation40_spill] sm:$0xff] }
 0x12f   :  { %v1191_v17 = vpack.c.bf16 %v1185_v63, %v1184_v49  ;;  %v1180_v28 = vadd.f32 %v3949_v36, %v3736_v13  ;;  %3043 = vmatpush3.bf16.msra.mxu1 %v1106_v27  ;;  %v1187_v6 = vmax.f32 %v1179_v23, 0.0  ;;  %v1181_v1 = vadd.f32 %v1173_v32, %v5235_v18 }
 0x130   :  { %3052 = vmatprep.subr.bf16.mxu0 %v1190_v10  ;;  %v5255_v38 = vmax.f32 %v5254_v52, 0.0  ;;  %v5257_v58 = vmax.f32 %v5256_v44, 0.0  ;;  %v1251_v56 = vadd.f32 %v3954_v41, %v3633_v35  ;;  %3044 = vmatprep.subr.bf16.mxu1 %v1107_v22  ;;  %v1108_v62 = vpack.c.bf16 %v1104_v21, %v1103_v24  ;;  %v5258_v24 = vld [vmem:[#allocation32_spill] sm:$0xff]  ;;  %v5265_v44 = vld [vmem:[#allocation38_spill] sm:$0xff] }
 0x131   :  { %3053 = vmatpush3.bf16.msra.mxu0 %v1190_v10  ;;  %v1188_v49 = vmax.f32 %v1180_v28, 0.0  ;;  %v1252_v36 = vadd.f32 %v3976_v55, %v3641_v39  ;;  %v1253_v27 = vadd.f32 %v3944_v9, %v3631_v34  ;;  %v1192_v32 = vpack.c.bf16 %v1187_v6, %v1186_v48 }
 0x132   :  { %v4092_v20 = vpack.c.bf16 %v5257_v58, %v5255_v38  ;;  %3054 = vmatprep.subr.bf16.mxu0 %v1191_v17  ;;  %v1189_v4 = vmax.f32 %v1181_v1, 0.0  ;;  %v1259_v63 = vadd.f32 %v1251_v56, %v3663_v50  ;;  %v1254_v19 = vadd.f32 %v3966_v29, %v3637_v37 }
 0x133   :  { %v1260_v35 = vadd.f32 %v1252_v36, %v3683_v60  ;;  %v1261_v46 = vadd.f32 %v1253_v27, %v3681_v59  ;;  %v5259_v21 = vmax.f32 %v5258_v24, 0.0  ;;  %v5261_v53 = vmax.f32 %v5260_v15, 0.0  ;;  %3045 = vmatpush3.bf16.msra.mxu1 %v1107_v22 }
 0x134   :  { %v5263_v34 = vmax.f32 %v5262_v11, 0.0  ;;  %v5264_v48 = vmax.f32 %v3814_v2, 0.0  ;;  %v1193_v3 = vpack.c.bf16 %v1189_v4, %v1188_v49  ;;  %v1267_v10 = vmax.f32 %v1259_v63, 0.0  ;;  %3046 = vmatprep.subr.bf16.mxu1 %v1108_v62 }
 0x135   :  { %v4109_v39 = vpack.c.bf16 %v5261_v53, %v5259_v21  ;;  %v1262_v37 = vadd.f32 %v1254_v19, %v3701_v5  ;;  %v1255_v23 = vadd.f32 %v4045_v31, %v3649_v43  ;;  %3055 = vmatpush3.bf16.msra.mxu0 %v1191_v17  ;;  %v1268_v28 = vmax.f32 %v1260_v35, 0.0 }
 0x136   :  { %v4115_v47 = vpack.c.bf16 %v5264_v48, %v5263_v34  ;;  %v1269_v6 = vmax.f32 %v1261_v46, 0.0  ;;  %v1256_v1 = vadd.f32 %v4070_v16, %v5242_v51  ;;  %v1257_v2 = vadd.f32 %v4031_v61, %v3647_v42  ;;  %3056 = vmatprep.subr.bf16.mxu0 %v1192_v32 }
 0x137   :  { %v1270_v52 = vmax.f32 %v1262_v37, 0.0  ;;  %v1263_v22 = vadd.f32 %v1255_v23, %v5226_v30  ;;  %v1258_v38 = vadd.f32 %v4058_v14, %v5230_v54  ;;  %v5266_v58 = vmax.f32 %v5265_v44, 0.0  ;;  %3047 = vmatpush3.bf16.msra.mxu1 %v1108_v62  ;;  %v5271_v37 = vld [vmem:[#allocation71_spill] sm:$0xff] }
 0x138   :  { %v5267_v43 = vmax.f32 %v3799_v12, 0.0  ;;  %v1275_v56 = vpack.c.bf16 %v1268_v28, %v1267_v10  ;;  %v1264_v49 = vadd.f32 %v1256_v1, %v3731_v8  ;;  %v1265_v51 = vadd.f32 %v1257_v2, %v3736_v13  ;;  %v5273_v1 = vld [vmem:[#allocation12_spill] sm:$0xff] }
 0x139   :  { %v1437_v42 = vmax.f32 %v3869_v0, 0.0  ;;  %v1276_v36 = vpack.c.bf16 %v1270_v52, %v1269_v6  ;;  %v1271_v27 = vmax.f32 %v1263_v22, 0.0  ;;  %v1266_v4 = vadd.f32 %v1258_v38, %v5235_v18  ;;  %3057 = vmatpush3.bf16.msra.mxu0 %v1192_v32  ;;  %v5274_v52 = vld [vmem:[#allocation57_spill] sm:$0xff] }
 0x13a   :  { %v4131_v17 = vpack.c.bf16 %v5267_v43, %v5266_v58  ;;  %v1438_v54 = vmax.f32 %v3923_v45, 0.0  ;;  %3064 = vmatprep.subr.bf16.mxu1 %v1275_v56  ;;  %v1272_v63 = vmax.f32 %v1264_v49, 0.0  ;;  %v1273_v12 = vmax.f32 %v1265_v51, 0.0  ;;  %3058 = vmatprep.subr.bf16.mxu0 %v1193_v3  ;;  %v5275_v38 = vld [vmem:[#allocation65_spill] sm:$0xff]  ;;  %v5276_v43 = vld [vmem:[#allocation54_spill] sm:$0xff]  ;;  %v5277_v49 = vld [vmem:[#allocation63_spill] sm:$0xff] }
 0x13b   :  { %v1514_v19 = vadd.f32 %v3857_v33, %v3663_v50  ;;  %v1515_v35 = vadd.f32 %v3917_v57, %v3683_v60  ;;  %v1274_v46 = vmax.f32 %v1266_v4, 0.0  ;;  %v1439_v62 = vmax.f32 %v3839_v7, 0.0  ;;  %3049 = vmatmul.mubr.msk.bf16.vlgmr.msra.gmra.mrb[36].mxu1 %vm932_vm1, %v3996_v26  ;;  %v5268_v57 = vld [vmem:[#allocation4_spill] sm:$0xff]  ;;  %v5269_v7 = vld [vmem:[#allocation47_spill] sm:$0xff] }
 0x13c   :  { %v4142_v0 = vpack.c.bf16 %v1438_v54, %v1437_v42  ;;  %v1440_v24 = vmax.f32 %v3903_v40, 0.0  ;;  %v1277_v45 = vpack.c.bf16 %v1272_v63, %v1271_v27  ;;  %v1516_v33 = vadd.f32 %v3834_v25, %v3681_v59  ;;  %3065 = vmatpush3.bf16.msra.mxu1 %v1275_v56  ;;  %3072 = vmatprep.mubr.msk.bf16.mxu1 %vm932_vm1, %v5268_v57  ;;  %v5270_v40 = vld [vmem:[#allocation10_spill] sm:$0xff]  ;;  %v5272_v25 = vld [vmem:[#allocation59_spill] sm:$0xff] }
 0x13d   :  { %v1522_v32 = vmax.f32 %v1514_v19, 0.0  ;;  %v1523_v21 = vmax.f32 %v1515_v35, 0.0  ;;  %v1278_v15 = vpack.c.bf16 %v1274_v46, %v1273_v12  ;;  %v1517_v11 = vadd.f32 %v5269_v7, %v3701_v5  ;;  %3059 = vmatpush3.bf16.msra.mxu0 %v1193_v3  ;;  %3066 = vmatprep.subr.bf16.mxu1 %v1276_v36  ;;  %v5278_v54 = vld [vmem:[#allocation6_spill] sm:$0xff]  ;;  %v5279_v35 = vld [vmem:[#allocation8_spill] sm:$0xff] }
 0x13e   :  { %v4152_v53 = vpack.c.bf16 %v1440_v24, %v1439_v62  ;;  %v1441_v34 = vmax.f32 %v5270_v40, 0.0  ;;  %v1524_v10 = vmax.f32 %v1516_v33, 0.0  ;;  %v1442_v23 = vmax.f32 %v5271_v37, 0.0  ;;  %3076 = vmatprep.subr.bf16.mxu0 %v4092_v20  ;;  %v5280_v62 = vld [vmem:[#allocation46_spill] sm:$0xff]  ;;  %v5284_v37 = vld [vmem:[#allocation41_spill] sm:$0xff] }
 0x13f   :  { %v4157_v48 = vpack.c.bf16 %v1523_v21, %v1522_v32  ;;  %v1518_v28 = vadd.f32 %v5272_v25, %v5226_v30  ;;  %v1525_v6 = vmax.f32 %v1517_v11, 0.0  ;;  %v1519_v2 = vadd.f32 %v5273_v1, %v3731_v8  ;;  %v5281_v21 = vld [vmem:[#allocation52_spill] sm:$0xff]  ;;  %v5285_v1 = vld [vmem:[#allocation50_spill] sm:$0xff] }
 0x140   :  { %v1443_v22 = vmax.f32 %v5274_v52, 0.0  ;;  %v1444_v44 = vmax.f32 %v5275_v38, 0.0  ;;  %v4167_v3 = vpack.c.bf16 %v1442_v23, %v1441_v34  ;;  %v1520_v56 = vadd.f32 %v5276_v43, %v3736_v13  ;;  %3061 = vmatmul.mubr.msk.bf16.vlgmr.msra.gmra.mrb[44].mxu0 %vm932_vm1, %v3996_v26  ;;  %3067 = vmatpush3.bf16.msra.mxu1 %v1276_v36  ;;  %v5283_v34 = vld [vmem:[#allocation7_spill] sm:$0xff] }
 0x141   :  { %v1526_v58 = vmax.f32 %v1518_v28, 0.0  ;;  %v1521_v51 = vadd.f32 %v5277_v49, %v5235_v18  ;;  %v4175_v42 = vpack.c.bf16 %v1525_v6, %v1524_v10  ;;  %v1527_v27 = vmax.f32 %v1519_v2, 0.0  ;;  %3077 = vmatpush3.bf16.msra.mxu0 %v4092_v20  ;;  %3068 = vmatprep.subr.bf16.mxu1 %v1277_v45  ;;  %v5282_v20 = vld [vmem:[#allocation5_spill] sm:$0xff]  ;;  %v5286_v38 = vld [vmem:[#allocation11_spill] sm:$0xff]  ;;  %v5288_v49 = vld [vmem:[#allocation62_spill] sm:$0xff] }
 0x142   :  { %v4177_v4 = vpack.c.bf16 %v1444_v44, %v1443_v22  ;;  %v1591_v63 = vadd.f32 %v3954_v41, %v5278_v54  ;;  %v1528_v12 = vmax.f32 %v1520_v56, 0.0  ;;  %v1592_v46 = vadd.f32 %v3976_v55, %v5279_v35  ;;  %3078 = vmatprep.subr.bf16.mxu0 %v4109_v39  ;;  %3084 = vmatprep.mubr.msk.bf16.mxu0 %vm932_vm1, %v5268_v57 }
 0x143   :  { %v1529_v19 = vmax.f32 %v1521_v51, 0.0  ;;  %v1692_v24 = vmax.f32 %v5280_v62, 0.0  ;;  %v4188_v36 = vpack.c.bf16 %v1527_v27, %v1526_v58  ;;  %v1693_v33 = vmax.f32 %v5281_v21, 0.0  ;;  %v5287_v58 = vld [vmem:[#allocation14_spill] sm:$0xff]  ;;  %v5289_v27 = vld [vmem:[#allocation72_spill] sm:$0xff] }
 0x144   :  { %v1599_v32 = vadd.f32 %v1591_v63, %v3663_v50  ;;  %v1593_v7 = vadd.f32 %v3944_v9, %v5282_v20  ;;  %v1600_v40 = vadd.f32 %v1592_v46, %v3683_v60  ;;  %v1594_v10 = vadd.f32 %v3966_v29, %v5283_v34  ;;  %3069 = vmatpush3.bf16.msra.mxu1 %v1277_v45  ;;  %v5290_v46 = vld [vmem:[#allocation9_spill] sm:$0xff]  ;;  %v5292_v21 = vld [vmem:[#allocation58_spill] sm:$0xff] }
 0x145   :  { %v4194_v11 = vpack.c.bf16 %v1529_v19, %v1528_v12  ;;  %v1694_v23 = vmax.f32 %v5284_v37, 0.0  ;;  %v4200_v28 = vpack.c.bf16 %v1693_v33, %v1692_v24  ;;  %v1695_v2 = vmax.f32 %v5285_v1, 0.0  ;;  %3079 = vmatpush3.bf16.msra.mxu0 %v4109_v39  ;;  %3070 = vmatprep.subr.bf16.mxu1 %v1278_v15  ;;  %v5291_v24 = vld [vmem:[#allocation13_spill] sm:$0xff]  ;;  %v5293_v34 = vld [vmem:[#allocation66_spill] sm:$0xff] }
 0x146   :  { %v1607_v25 = vmax.f32 %v1599_v32, 0.0  ;;  %v1601_v6 = vadd.f32 %v1593_v7, %v3681_v59  ;;  %v1608_v52 = vmax.f32 %v1600_v40, 0.0  ;;  %v1602_v22 = vadd.f32 %v1594_v10, %v3701_v5  ;;  %3080 = vmatprep.subr.bf16.mxu0 %v4115_v47 }
 0x147   :  { %v1595_v44 = vadd.f32 %v4045_v31, %v5286_v38  ;;  %v1596_v43 = vadd.f32 %v4070_v16, %v5287_v58  ;;  %v4211_v56 = vpack.c.bf16 %v1695_v2, %v1694_v23  ;;  %v1696_v51 = vmax.f32 %v5288_v49, 0.0  ;;  %v5294_v23 = vld [vmem:[#allocation44_spill] sm:$0xff] }
 0x148   :  { %v1609_v45 = vmax.f32 %v1601_v6, 0.0  ;;  %v1697_v54 = vmax.f32 %v5289_v27, 0.0  ;;  %v4215_v39 = vpack.c.bf16 %v1608_v52, %v1607_v25  ;;  %v1610_v63 = vmax.f32 %v1602_v22, 0.0  ;;  %3071 = vmatpush3.bf16.msra.mxu1 %v1278_v15  ;;  %v5295_v6 = vld [vmem:[#allocation51_spill] sm:$0xff]  ;;  %v5296_v52 = vld [vmem:[#allocation16_spill] sm:$0xff] }
 0x149   :  { %v1603_v12 = vadd.f32 %v1595_v44, %v5226_v30  ;;  %v1604_v19 = vadd.f32 %v1596_v43, %v3731_v8  ;;  %v1597_v62 = vadd.f32 %v4031_v61, %v5290_v46  ;;  %v1598_v32 = vadd.f32 %v4058_v14, %v5291_v24  ;;  %3081 = vmatpush3.bf16.msra.mxu0 %v4115_v47  ;;  %v5297_v38 = vld [vmem:[#allocation20_spill] sm:$0xff] }
 0x14a   :  { %v4219_v35 = vpack.c.bf16 %v1697_v54, %v1696_v51  ;;  %v1698_v33 = vmax.f32 %v5292_v21, 0.0  ;;  %3088 = vmatprep.subr.bf16.mxu1 %v4142_v0  ;;  %v4228_v20 = vpack.c.bf16 %v1610_v63, %v1609_v45  ;;  %v1699_v15 = vmax.f32 %v5293_v34, 0.0  ;;  %3082 = vmatprep.subr.bf16.mxu0 %v4131_v17  ;;  %v5298_v54 = vld [vmem:[#allocation42_spill] sm:$0xff] }
 0x14b   :  { %v1611_v7 = vmax.f32 %v1603_v12, 0.0  ;;  %v1612_v40 = vmax.f32 %v1604_v19, 0.0  ;;  %v1605_v10 = vadd.f32 %v1597_v62, %v3736_v13  ;;  %v1606_v37 = vadd.f32 %v1598_v32, %v5235_v18  ;;  %3073 = vmatmul.mubr.msk.bf16.vlgmr.msra.gmra.mrb[40].mxu1 %vm932_vm1, %v3996_v26  ;;  %v5299_v19 = vld [vmem:[#allocation48_spill] sm:$0xff]  ;;  %v5300_v62 = vld [vmem:[#allocation15_spill] sm:$0xff] }
 0x14c   :  { %v1769_v25 = vadd.f32 %v5294_v23, %v3663_v50  ;;  %v1770_v47 = vadd.f32 %v5295_v6, %v3683_v60  ;;  %v4242_v2 = vpack.c.bf16 %v1699_v15, %v1698_v33  ;;  %v1846_v22 = vadd.f32 %v3954_v41, %v5296_v52  ;;  %3089 = vmatpush3.bf16.msra.mxu1 %v4142_v0  ;;  %v5301_v33 = vld [vmem:[#allocation18_spill] sm:$0xff]  ;;  %v5302_v15 = vld [vmem:[#allocation60_spill] sm:$0xff] }
 0x14d   :  { %v4240_v1 = vpack.c.bf16 %v1612_v40, %v1611_v7  ;;  %v1847_v44 = vadd.f32 %v3976_v55, %v5297_v38  ;;  %3096 = vmatprep.mubr.msk.bf16.mxu1 %vm932_vm1, %v5268_v57  ;;  %v1613_v58 = vmax.f32 %v1605_v10, 0.0  ;;  %v1614_v43 = vmax.f32 %v1606_v37, 0.0  ;;  %3083 = vmatpush3.bf16.msra.mxu0 %v4131_v17  ;;  %v5303_v37 = vld [vmem:[#allocation68_spill] sm:$0xff] }
 0x14e   :  { %v1777_v45 = vmax.f32 %v1769_v25, 0.0  ;;  %v1778_v49 = vmax.f32 %v1770_v47, 0.0  ;;  %3090 = vmatprep.subr.bf16.mxu1 %v4152_v53  ;;  %v1854_v51 = vadd.f32 %v1846_v22, %v3663_v50  ;;  %v1771_v63 = vadd.f32 %v5298_v54, %v3681_v59  ;;  %3100 = vmatprep.subr.bf16.mxu0 %v4157_v48  ;;  %v5304_v47 = vld [vmem:[#allocation24_spill] sm:$0xff] }
 0x14f   :  { %v1855_v27 = vadd.f32 %v1847_v44, %v3683_v60  ;;  %v4258_v0 = vpack.c.bf16 %v1614_v43, %v1613_v58  ;;  %v1772_v46 = vadd.f32 %v5299_v19, %v3701_v5  ;;  %v1848_v17 = vadd.f32 %v3944_v9, %v5300_v62  ;;  %v5305_v58 = vld [vmem:[#allocation28_spill] sm:$0xff] }
 0x150   :  { %v4260_v12 = vpack.c.bf16 %v1778_v49, %v1777_v45  ;;  %v1862_v24 = vmax.f32 %v1854_v51, 0.0  ;;  %v1779_v21 = vmax.f32 %v1771_v63, 0.0  ;;  %v1849_v7 = vadd.f32 %v3966_v29, %v5301_v33  ;;  %3085 = vmatmul.mubr.msk.bf16.vlgmr.msra.gmra.mrb[48].mxu0 %vm932_vm1, %v3996_v26  ;;  %3091 = vmatpush3.bf16.msra.mxu1 %v4152_v53  ;;  %v5306_v49 = vld [vmem:[#allocation55_spill] sm:$0xff] }
 0x151   :  { %v1863_v32 = vmax.f32 %v1855_v27, 0.0  ;;  %v1780_v40 = vmax.f32 %v1772_v46, 0.0  ;;  %v1856_v34 = vadd.f32 %v1848_v17, %v3681_v59  ;;  %v1773_v10 = vadd.f32 %v5302_v15, %v5226_v30  ;;  %3101 = vmatpush3.bf16.msra.mxu0 %v4157_v48  ;;  %3092 = vmatprep.subr.bf16.mxu1 %v4167_v3  ;;  %v5308_v63 = vld [vmem:[#allocation23_spill] sm:$0xff]  ;;  %v5309_v46 = vld [vmem:[#allocation26_spill] sm:$0xff] }
 0x152   :  { %v1774_v23 = vadd.f32 %v5303_v37, %v3731_v8  ;;  %v1857_v6 = vadd.f32 %v1849_v7, %v3701_v5  ;;  %v1850_v53 = vadd.f32 %v4045_v31, %v5304_v47  ;;  %3102 = vmatprep.subr.bf16.mxu0 %v4175_v42  ;;  %3108 = vmatprep.mubr.msk.bf16.mxu0 %vm932_vm1, %v5268_v57  ;;  %v5307_v57 = vld [vmem:[#allocation64_spill] sm:$0xff]  ;;  %v5312_v37 = vld [vmem:[#allocation19_spill] sm:$0xff] }
 0x153   :  { %v4278_v25 = vpack.c.bf16 %v1863_v32, %v1862_v24  ;;  %v4286_v52 = vpack.c.bf16 %v1780_v40, %v1779_v21  ;;  %v1864_v22 = vmax.f32 %v1856_v34, 0.0  ;;  %v1781_v38 = vmax.f32 %v1773_v10, 0.0  ;;  %v5310_v40 = vld [vmem:[#allocation45_spill] sm:$0xff] }
 0x154   :  { %v1782_v44 = vmax.f32 %v1774_v23, 0.0  ;;  %v1865_v48 = vmax.f32 %v1857_v6, 0.0  ;;  %v1851_v43 = vadd.f32 %v4070_v16, %v5305_v58  ;;  %v1858_v45 = vadd.f32 %v1850_v53, %v5226_v30  ;;  %3093 = vmatpush3.bf16.msra.mxu1 %v4167_v3  ;;  %v5313_v6 = vld [vmem:[#allocation22_spill] sm:$0xff] }
 0x155   :  { %v1775_v51 = vadd.f32 %v5306_v49, %v3736_v13  ;;  %v1776_v54 = vadd.f32 %v5307_v57, %v5235_v18  ;;  %v1852_v19 = vadd.f32 %v4031_v61, %v5308_v63  ;;  %v1853_v62 = vadd.f32 %v4058_v14, %v5309_v46  ;;  %3103 = vmatpush3.bf16.msra.mxu0 %v4175_v42  ;;  %v5311_v42 = vld [vmem:[#allocation53_spill] sm:$0xff] }
 0x156   :  { %v4294_v27 = vpack.c.bf16 %v1782_v44, %v1781_v38  ;;  %3094 = vmatprep.subr.bf16.mxu1 %v4177_v4  ;;  %v4304_v17 = vpack.c.bf16 %v1865_v48, %v1864_v22  ;;  %v1859_v24 = vadd.f32 %v1851_v43, %v3731_v8  ;;  %v1866_v3 = vmax.f32 %v1858_v45, 0.0  ;;  %3104 = vmatprep.subr.bf16.mxu0 %v4188_v36  ;;  %v5315_v57 = vld [vmem:[#allocation49_spill] sm:$0xff] }
 0x157   :  { %v1783_v32 = vmax.f32 %v1775_v51, 0.0  ;;  %v1784_v21 = vmax.f32 %v1776_v54, 0.0  ;;  %v1860_v33 = vadd.f32 %v1852_v19, %v3736_v13  ;;  %v1861_v7 = vadd.f32 %v1853_v62, %v5235_v18 }
 0x158   :  { %v1939_v34 = vadd.f32 %v5310_v40, %v3663_v50  ;;  %v1867_v15 = vmax.f32 %v1859_v24, 0.0  ;;  %v1940_v10 = vadd.f32 %v5311_v42, %v3683_v60  ;;  %v2016_v23 = vadd.f32 %v3954_v41, %v5312_v37  ;;  %3095 = vmatpush3.bf16.msra.mxu1 %v4177_v4  ;;  %v5314_v4 = vld [vmem:[#allocation43_spill] sm:$0xff]  ;;  %v5317_v24 = vld [vmem:[#allocation21_spill] sm:$0xff] }
 0x159   :  { %v2017_v47 = vadd.f32 %v3976_v55, %v5313_v6  ;;  %v4319_v53 = vpack.c.bf16 %v1784_v21, %v1783_v32  ;;  %v1868_v22 = vmax.f32 %v1860_v33, 0.0  ;;  %v1869_v38 = vmax.f32 %v1861_v7, 0.0  ;;  %3105 = vmatpush3.bf16.msra.mxu0 %v4188_v36  ;;  %3112 = vmatprep.subr.bf16.mxu1 %v4215_v39  ;;  %v5316_v36 = vld [vmem:[#allocation17_spill] sm:$0xff]  ;;  %v4346_v32 = vld [vmem:[%s5096_s4] sm:$0xff]  }
 0x15a   :  { %v1947_v44 = vmax.f32 %v1939_v34, 0.0  ;;  %v4323_v48 = vpack.c.bf16 %v1867_v15, %v1866_v3  ;;  %v1948_v58 = vmax.f32 %v1940_v10, 0.0  ;;  %v2024_v43 = vadd.f32 %v2016_v23, %v3663_v50  ;;  %3106 = vmatprep.subr.bf16.mxu0 %v4194_v11  ;;  %v5318_v40 = vld [vmem:[#allocation61_spill] sm:$0xff] }
 0x15b   :  { %v2025_v45 = vadd.f32 %v2017_v47, %v3683_v60  ;;  %v4328_v49 = vpack.c.bf16 %v1869_v38, %v1868_v22  ;;  %v1941_v51 = vadd.f32 %v5314_v4, %v3681_v59  ;;  %v1942_v54 = vadd.f32 %v5315_v57, %v3701_v5  ;;  %3097 = vmatmul.mubr.msk.bf16.vlgmr.msra.gmra.mrb[44].mxu1 %vm932_vm1, %v3996_v26  ;;  %v5319_v42 = vld [vmem:[#allocation69_spill] sm:$0xff]  ;;  %v5320_v47 = vld [vmem:[#allocation27_spill] sm:$0xff] }
 0x15c   :  { %v2018_v63 = vadd.f32 %v3944_v9, %v5316_v36  ;;  %v4338_v19 = vpack.c.bf16 %v1948_v58, %v1947_v44  ;;  %v2032_v46 = vmax.f32 %v2024_v43, 0.0  ;;  %v2019_v3 = vadd.f32 %v3966_v29, %v5317_v24  ;;  %3113 = vmatpush3.bf16.msra.mxu1 %v4215_v39  ;;  %3120 = vmatprep.mubr.msk.bf16.mxu1 %vm932_vm1, %v4346_v32  ;;  %v5321_v44 = vld [vmem:[#allocation30_spill] sm:$0xff]  ;;  %v5322_v43 = vld [vmem:[#allocation56_spill] sm:$0xff] }
 0x15d   :  { %v2033_v62 = vmax.f32 %v2025_v45, 0.0  ;;  %v1949_v21 = vmax.f32 %v1941_v51, 0.0  ;;  %v1950_v33 = vmax.f32 %v1942_v54, 0.0  ;;  %v1943_v34 = vadd.f32 %v5318_v40, %v5226_v30  ;;  %3107 = vmatpush3.bf16.msra.mxu0 %v4194_v11  ;;  %3114 = vmatprep.subr.bf16.mxu1 %v4228_v20  ;;  %v5323_v51 = vld [vmem:[#allocation67_spill] sm:$0xff]  ;;  %v5324_v54 = vld [vmem:[#allocation25_spill] sm:$0xff] }
 0x15e   :  { %v2026_v7 = vadd.f32 %v2018_v63, %v3681_v59  ;;  %v2027_v15 = vadd.f32 %v2019_v3, %v3701_v5  ;;  %v1944_v10 = vadd.f32 %v5319_v42, %v3731_v8  ;;  %3124 = vmatprep.subr.bf16.mxu0 %v4200_v28  ;;  %v2020_v22 = vadd.f32 %v4045_v31, %v5320_v47  ;;  %v5325_v3 = vld [vmem:[#allocation29_spill] sm:$0xff] }
 0x15f   :  { %v4355_v39 = vpack.c.bf16 %v2033_v62, %v2032_v46  ;;  %v4361_v37 = vpack.c.bf16 %v1950_v33, %v1949_v21  ;;  %v1951_v6 = vmax.f32 %v1943_v34, 0.0  ;;  %v2021_v58 = vadd.f32 %v4070_v16, %v5321_v44 }
 0x160   :  { %v2034_v23 = vmax.f32 %v2026_v7, 0.0  ;;  %v2035_v38 = vmax.f32 %v2027_v15, 0.0  ;;  %v1952_v11 = vmax.f32 %v1944_v10, 0.0  ;;  %v1945_v45 = vadd.f32 %v5322_v43, %v3736_v13  ;;  %3109 = vmatmul.mubr.msk.bf16.vlgmr.msra.gmra.mrb[52].mxu0 %vm932_vm1, %v3996_v26  ;;  %3115 = vmatpush3.bf16.msra.mxu1 %v4228_v20 }
 0x161   :  { %v2028_v4 = vadd.f32 %v2020_v22, %v5226_v30  ;;  %v1946_v57 = vadd.f32 %v5323_v51, %v5235_v18  ;;  %v2022_v36 = vadd.f32 %v4031_v61, %v5324_v54  ;;  %3125 = vmatpush3.bf16.msra.mxu0 %v4200_v28  ;;  %3116 = vmatprep.subr.bf16.mxu1 %v4240_v1 }
 0x162   :  { %v2041_v63 = vpack.c.bf16 %v2035_v38, %v2034_v23  ;;  %v1957_v46 = vpack.c.bf16 %v1952_v11, %v1951_v6  ;;  %v2029_v62 = vadd.f32 %v2021_v58, %v3731_v8  ;;  %3126 = vmatprep.subr.bf16.mxu0 %v4211_v56  ;;  %3132 = vmatprep.mubr.msk.bf16.mxu0 %vm932_vm1, %v4346_v32  ;;  %v1953_v20 = vmax.f32 %v1945_v45, 0.0 }
 0x163   :  { %v1954_v24 = vmax.f32 %v1946_v57, 0.0  ;;  %v2023_v21 = vadd.f32 %v4058_v14, %v5325_v3  ;;  %v2030_v33 = vadd.f32 %v2022_v36, %v3736_v13  ;;  %v2036_v7 = vmax.f32 %v2028_v4, 0.0 }
 0x164   :  { %v2037_v28 = vmax.f32 %v2029_v62, 0.0  ;;  %3117 = vmatpush3.bf16.msra.mxu1 %v4240_v1  ;;  %v5327_v1 = vld [vmem:[#allocation3_spill] sm:$0xff] }
 0x165   :  { %v1958_v40 = vpack.c.bf16 %v1954_v24, %v1953_v20  ;;  %v2031_v34 = vadd.f32 %v2023_v21, %v5235_v18  ;;  %3127 = vmatpush3.bf16.msra.mxu0 %v4211_v56  ;;  %3118 = vmatprep.subr.bf16.mxu1 %v4258_v0  ;;  %v2038_v42 = vmax.f32 %v2030_v33, 0.0  ;;  %v5326_v56 = vld [vmem:[#allocation2_spill] sm:$0xff] }
 0x166   :  { %v2042_v15 = vpack.c.bf16 %v2037_v28, %v2036_v7  ;;  %3128 = vmatprep.subr.bf16.mxu0 %v4219_v35 }
 0x167   :  { %v2039_v10 = vmax.f32 %v2031_v34, 0.0 }
 0x168   :  { %3119 = vmatpush3.bf16.msra.mxu1 %v4258_v0  ;;  %v3397_v0 = vld [vmem:[%s5092_s1 + $0x10] sm:$0xff]  }
 0x169   :  { %v2043_v23 = vpack.c.bf16 %v2039_v10, %v2038_v42  ;;  %3129 = vmatpush3.bf16.msra.mxu0 %v4219_v35  ;;  %3136 = vmatprep.subr.bf16.mxu1 %v4260_v12  ;;  %v3395_v35 = vld [vmem:[%s5092_s1] sm:$0xff]  }
 0x16a   :  { %3130 = vmatprep.subr.bf16.mxu0 %v4242_v2 }
 0x16b   :  { %3121 = vmatmul.mubr.msk.bf16.vlgmr.msra.gmra.mrb[48].mxu1 %vm932_vm1, %v3996_v26 }
 0x16c   :  { %3137 = vmatpush3.bf16.msra.mxu1 %v4260_v12  ;;  %3144 = vmatprep.mubr.msk.bf16.mxu1 %vm932_vm1, %v4346_v32  ;;  %v3398_v12 = vld [vmem:[%s5092_s1 + $0x18] sm:$0xff]  }
 0x16d   :  { %3131 = vmatpush3.bf16.msra.mxu0 %v4242_v2  ;;  %3138 = vmatprep.subr.bf16.mxu1 %v4286_v52  ;;  %v3396_v2 = vld [vmem:[%s5092_s1 + $0x8] sm:$0xff]  }
 0x16e   :  { %3148 = vmatprep.subr.bf16.mxu0 %v4278_v25 }
 0x170   :  { %3133 = vmatmul.mubr.msk.bf16.vlgmr.msra.gmra.mrb[56].mxu0 %vm932_vm1, %v3996_v26  ;;  %3139 = vmatpush3.bf16.msra.mxu1 %v4286_v52 }
 0x171   :  { %3149 = vmatpush3.bf16.msra.mxu0 %v4278_v25  ;;  %3140 = vmatprep.subr.bf16.mxu1 %v4294_v27  ;;  %v4461_v25 = vpop.permute.xlu1 %909 }
 0x172   :  { %3150 = vmatprep.subr.bf16.mxu0 %v4304_v17  ;;  %3156 = vmatprep.mubr.msk.bf16.mxu0 %vm932_vm1, %v4346_v32 }
 0x174   :  { %3141 = vmatpush3.bf16.msra.mxu1 %v4294_v27 }
 0x175   :  { %3151 = vmatpush3.bf16.msra.mxu0 %v4304_v17  ;;  %3142 = vmatprep.subr.bf16.mxu1 %v4319_v53  ;;  %v4465_v27 = vpop.permute.xlu1 %919 }
 0x176   :  { %3152 = vmatprep.subr.bf16.mxu0 %v4323_v48 }
 0x178   :  { %3143 = vmatpush3.bf16.msra.mxu1 %v4319_v53 }
 0x179   :  { %3153 = vmatpush3.bf16.msra.mxu0 %v4323_v48  ;;  %3160 = vmatprep.subr.bf16.mxu1 %v4338_v19 }
 0x17a   :  { %3154 = vmatprep.subr.bf16.mxu0 %v4328_v49 }
 0x17b   :  { %3145 = vmatmul.mubr.msk.bf16.vlgmr.msra.gmra.mrb[52].mxu1 %vm932_vm1, %v3996_v26 }
 0x17c   :  { %3161 = vmatpush3.bf16.msra.mxu1 %v4338_v19  ;;  %3168 = vmatprep.mubr.msk.bf16.mxu1 %vm932_vm1, %v4346_v32 }
 0x17d   :  { %3155 = vmatpush3.bf16.msra.mxu0 %v4328_v49  ;;  %3162 = vmatprep.subr.bf16.mxu1 %v4361_v37 }
 0x17e   :  { %3172 = vmatprep.subr.bf16.mxu0 %v4355_v39 }
 0x180   :  { %3157 = vmatmul.mubr.msk.bf16.vlgmr.msra.gmra.mrb[60].mxu0 %vm932_vm1, %v3996_v26  ;;  %3163 = vmatpush3.bf16.msra.mxu1 %v4361_v37 }
 0x181   :  { %3173 = vmatpush3.bf16.msra.mxu0 %v4355_v39  ;;  %3164 = vmatprep.subr.bf16.mxu1 %v1957_v46 }
 0x182   :  { %3174 = vmatprep.subr.bf16.mxu0 %v2041_v63  ;;  %3180 = vmatprep.mubr.msk.bf16.mxu0 %vm932_vm1, %v4346_v32 }
 0x184   :  { %3165 = vmatpush3.bf16.msra.mxu1 %v1957_v46 }
 0x185   :  { %3175 = vmatpush3.bf16.msra.mxu0 %v2041_v63  ;;  %3166 = vmatprep.subr.bf16.mxu1 %v1958_v40 }
 0x186   :  { %3176 = vmatprep.subr.bf16.mxu0 %v2042_v15 }
 0x188   :  { %3167 = vmatpush3.bf16.msra.mxu1 %v1958_v40 }
 0x189   :  { %3177 = vmatpush3.bf16.msra.mxu0 %v2042_v15  ;;  %3184 = vmatprep.subr.bf16.mxu1 %v5326_v56 }
 0x18a   :  { %3178 = vmatprep.subr.bf16.mxu0 %v2043_v23 }
 0x18b   :  { %3169 = vmatmul.mubr.msk.bf16.vlgmr.msra.gmra.mrb[56].mxu1 %vm932_vm1, %v3996_v26 }
 0x18c   :  { %3185 = vmatpush3.bf16.msra.mxu1 %v5326_v56  ;;  %3188 = vmatprep.mubr.msk.bf16.mxu1 %vm144_vm0, %v3395_v35 }
 0x18d   :  { %3179 = vmatpush3.bf16.msra.mxu0 %v2043_v23  ;;  %3186 = vmatprep.subr.bf16.mxu1 %v5327_v1 }
 0x190   :  { %3181 = vmatmul.mubr.msk.bf16.vlgmr.msra.gmra.mrb[64].mxu0 %vm932_vm1, %v3996_v26  ;;  %3187 = vmatpush3.bf16.msra.mxu1 %v5327_v1  ;;  %v4459_v26 = vpop.permute.xlu0 %904 }
 0x191   :  { %5328 = vst [vmem:[#allocation33_spill] sm:$0xff] %v4459_v26 }
 0x193   :  { %3189 = vmatmul.mubr.msk.bf16.vlgmr.msra.gmra.mrb[60].mxu1 %vm144_vm0, %v3396_v2 }
 0x194   :  { %3192 = vmatprep.mubr.msk.bf16.mxu1 %vm144_vm0, %v3397_v0  ;;  %v4463_v52 = vpop.permute.xlu0 %914 }
 0x195   :  { %5329 = vst [vmem:[#allocation37_spill] sm:$0xff] %v4463_v52 }
 0x19b   :  { %3193 = vmatmul.mubr.msk.bf16.gmra.mrb[64].mxu1 %vm144_vm0, %v3398_v12 }
 0x19c   :  { %3204 = vmatprep.mubr.msk.bf16.mxu1 %vm932_vm1, %v4346_v32 }
 0x1f8   :  { %v3026_v17 = vpop.f32.mrb[32].mxu1 }
 0x1f9   :  { %v982_v53 = vadd.f32 %v3026_v17, %v4463_v52  ;;  %v973_v49 = vpop.f32.mrb[33].mxu1 }
 0x1fa   :  { %v3038_v48 = vpop.f32.mrb[40].mxu0  ;;  %v974_v39 = vadd.f32 %v973_v49, %v4459_v26  ;;  %v3027_v6 = vpop.f32.mrb[34].mxu1 }
 0x1fb   :  { %v1067_v19 = vadd.f32 %v3038_v48, %v4463_v52  ;;  %v1058_v37 = vpop.f32.mrb[41].mxu0  ;;  %v985_v47 = vadd.f32 %v3027_v6, %v4465_v27  ;;  %v976_v38 = vpop.f32.mrb[35].mxu1  ;;  %v990_v43 = vmax.f32 %v982_v53, 0.0 }
 0x1fc   :  { %v1059_v32 = vadd.f32 %v1058_v37, %v4459_v26  ;;  %v3039_v22 = vpop.f32.mrb[42].mxu0  ;;  %v977_v44 = vadd.f32 %v976_v38, %v4461_v25  ;;  %v988_v57 = vmax.f32 %v974_v39, 0.0 }
 0x1fd   :  { %v1070_v11 = vadd.f32 %v3039_v22, %v4465_v27  ;;  %v1061_v58 = vpop.f32.mrb[43].mxu0  ;;  %v991_v45 = vmax.f32 %v985_v47, 0.0  ;;  %v1075_v51 = vmax.f32 %v1067_v19, 0.0 }
 0x1fe   :  { %v1062_v4 = vadd.f32 %v1061_v58, %v4461_v25  ;;  %v989_v36 = vmax.f32 %v977_v44, 0.0  ;;  %v1073_v63 = vmax.f32 %v1059_v32, 0.0 }
 0x1ff   :  { %v1076_v54 = vmax.f32 %v1070_v11, 0.0  ;;  %v4475_v46 = vpack.c.bf16 %v991_v45, %v990_v43 }
 0x200   :  { %v1074_v62 = vmax.f32 %v1062_v4, 0.0  ;;  %v4479_v24 = vpack.c.bf16 %v989_v36, %v988_v57 }
 0x201   :  { %5330 = vst [vmem:[#allocation32_spill] sm:$0xff] %v4475_v46  ;;  %v4477_v20 = vpack.c.bf16 %v1076_v54, %v1075_v51 }
 0x202   :  { %5332 = vst [vmem:[#allocation40_spill] sm:$0xff] %v4479_v24  ;;  %v4481_v3 = vpack.c.bf16 %v1074_v62, %v1073_v63 }
 0x203   :  { %5331 = vst [vmem:[#allocation36_spill] sm:$0xff] %v4477_v20 }
 0x204   :  { %5333 = vst [vmem:[#allocation38_spill] sm:$0xff] %v4481_v3 }
 0x20e   :  { %v3050_v21 = vpop.f32.mrb[36].mxu1 }
 0x20f   :  { %v1152_v33 = vadd.f32 %v3050_v21, %v4463_v52  ;;  %v1143_v7 = vpop.f32.mrb[37].mxu1 }
 0x210   :  { %v1144_v28 = vadd.f32 %v1143_v7, %v4459_v26  ;;  %v3051_v40 = vpop.f32.mrb[38].mxu1 }
 0x211   :  { %v1155_v34 = vadd.f32 %v3051_v40, %v4465_v27  ;;  %v1146_v15 = vpop.f32.mrb[39].mxu1  ;;  %v1160_v10 = vmax.f32 %v1152_v33, 0.0 }
 0x212   :  { %v1147_v42 = vadd.f32 %v1146_v15, %v4461_v25  ;;  %v1158_v1 = vmax.f32 %v1144_v28, 0.0 }
 0x213   :  { %v3062_v23 = vpop.f32.mrb[44].mxu0  ;;  %v1161_v56 = vmax.f32 %v1155_v34, 0.0 }
 0x214   :  { %v1237_v35 = vadd.f32 %v3062_v23, %v4463_v52  ;;  %v1228_v2 = vpop.f32.mrb[45].mxu0  ;;  %v1159_v0 = vmax.f32 %v1147_v42, 0.0 }
 0x215   :  { %v1229_v12 = vadd.f32 %v1228_v2, %v4459_v26  ;;  %v4489_v17 = vpack.c.bf16 %v1161_v56, %v1160_v10  ;;  %v3063_v53 = vpop.f32.mrb[46].mxu0 }
 0x216   :  { %v1240_v48 = vadd.f32 %v3063_v53, %v4465_v27  ;;  %v4492_v49 = vpack.c.bf16 %v1159_v0, %v1158_v1  ;;  %v1231_v19 = vpop.f32.mrb[47].mxu0  ;;  %v1245_v37 = vmax.f32 %v1237_v35, 0.0 }
 0x217   :  { %5334 = vst [vmem:[#allocation4_spill] sm:$0xff] %v4489_v17  ;;  %v1232_v39 = vadd.f32 %v1231_v19, %v4461_v25  ;;  %v1243_v32 = vmax.f32 %v1229_v12, 0.0 }
 0x218   :  { %5335 = vst [vmem:[#allocation47_spill] sm:$0xff] %v4492_v49  ;;  %v1246_v6 = vmax.f32 %v1240_v48, 0.0  ;;  %v2413_v49 = vld [vmem:[%s5097_s7 + $0x8] sm:$0xff] }
 0x219   :  { %v1244_v47 = vmax.f32 %v1232_v39, 0.0  ;;  %2490 = vmatprep.mubr.f32.mxu0 %v2413_v49 }
 0x21a   :  { %v4495_v22 = vpack.c.bf16 %v1246_v6, %v1245_v37 }
 0x21b   :  { %v4497_v38 = vpack.c.bf16 %v1244_v47, %v1243_v32 }
 0x21c   :  { %5336 = vst [vmem:[#allocation10_spill] sm:$0xff] %v4495_v22 }
 0x21d   :  { %5337 = vst [vmem:[#allocation71_spill] sm:$0xff] %v4497_v38 }
 0x21e   :  { %v3074_v11 = vpop.f32.mrb[40].mxu1 }
 0x21f   :  { %v1322_v44 = vadd.f32 %v3074_v11, %v4463_v52  ;;  %v1313_v58 = vpop.f32.mrb[41].mxu1 }
 0x220   :  { %v1314_v43 = vadd.f32 %v1313_v58, %v4459_v26  ;;  %v3075_v45 = vpop.f32.mrb[42].mxu1 }
 0x221   :  { %v1325_v4 = vadd.f32 %v3075_v45, %v4465_v27  ;;  %v1316_v51 = vpop.f32.mrb[43].mxu1  ;;  %v1330_v54 = vmax.f32 %v1322_v44, 0.0 }
 0x222   :  { %v1317_v57 = vadd.f32 %v1316_v51, %v4461_v25  ;;  %v1328_v21 = vmax.f32 %v1314_v43, 0.0 }
 0x223   :  { %v3086_v36 = vpop.f32.mrb[48].mxu0  ;;  %v1331_v63 = vmax.f32 %v1325_v4, 0.0 }
 0x224   :  { %v1407_v62 = vadd.f32 %v3086_v36, %v4463_v52  ;;  %v1398_v33 = vpop.f32.mrb[49].mxu0  ;;  %v1329_v7 = vmax.f32 %v1317_v57, 0.0 }
 0x225   :  { %v1399_v28 = vadd.f32 %v1398_v33, %v4459_v26  ;;  %v4505_v40 = vpack.c.bf16 %v1331_v63, %v1330_v54  ;;  %v3087_v34 = vpop.f32.mrb[50].mxu0 }
 0x226   :  { %v1410_v15 = vadd.f32 %v3087_v34, %v4465_v27  ;;  %v4508_v42 = vpack.c.bf16 %v1329_v7, %v1328_v21  ;;  %v1401_v10 = vpop.f32.mrb[51].mxu0  ;;  %v1415_v56 = vmax.f32 %v1407_v62, 0.0 }
 0x227   :  { %5338 = vst [vmem:[#allocation59_spill] sm:$0xff] %v4505_v40  ;;  %v1402_v23 = vadd.f32 %v1401_v10, %v4461_v25  ;;  %v1413_v1 = vmax.f32 %v1399_v28, 0.0 }
 0x228   :  { %5339 = vst [vmem:[#allocation12_spill] sm:$0xff] %v4508_v42  ;;  %v1416_v35 = vmax.f32 %v1410_v15, 0.0 }
 0x229   :  { %v1414_v2 = vmax.f32 %v1402_v23, 0.0 }
 0x22a   :  { %v4511_v0 = vpack.c.bf16 %v1416_v35, %v1415_v56 }
 0x22b   :  { %v4513_v12 = vpack.c.bf16 %v1414_v2, %v1413_v1 }
 0x22c   :  { %5340 = vst [vmem:[#allocation57_spill] sm:$0xff] %v4511_v0 }
 0x22d   :  { %5341 = vst [vmem:[#allocation65_spill] sm:$0xff] %v4513_v12 }
 0x22e   :  { %v3098_v53 = vpop.f32.mrb[44].mxu1 }
 0x22f   :  { %v1492_v48 = vadd.f32 %v3098_v53, %v4463_v52  ;;  %v1483_v19 = vpop.f32.mrb[45].mxu1 }
 0x230   :  { %v1484_v39 = vadd.f32 %v1483_v19, %v4459_v26  ;;  %v3099_v37 = vpop.f32.mrb[46].mxu1 }
 0x231   :  { %v1495_v6 = vadd.f32 %v3099_v37, %v4465_v27  ;;  %v1486_v32 = vpop.f32.mrb[47].mxu1  ;;  %v1500_v11 = vmax.f32 %v1492_v48, 0.0 }
 0x232   :  { %v1487_v47 = vadd.f32 %v1486_v32, %v4461_v25  ;;  %v1498_v45 = vmax.f32 %v1484_v39, 0.0 }
 0x233   :  { %v3110_v44 = vpop.f32.mrb[52].mxu0  ;;  %v1501_v58 = vmax.f32 %v1495_v6, 0.0 }
 0x234   :  { %v1577_v43 = vadd.f32 %v3110_v44, %v4463_v52  ;;  %v1568_v4 = vpop.f32.mrb[53].mxu0  ;;  %v1499_v51 = vmax.f32 %v1487_v47, 0.0 }
 0x235   :  { %v1569_v57 = vadd.f32 %v1568_v4, %v4459_v26  ;;  %v4521_v54 = vpack.c.bf16 %v1501_v58, %v1500_v11  ;;  %v3111_v36 = vpop.f32.mrb[54].mxu0 }
 0x236   :  { %v1580_v63 = vadd.f32 %v3111_v36, %v4465_v27  ;;  %v4524_v62 = vpack.c.bf16 %v1499_v51, %v1498_v45  ;;  %v1571_v21 = vpop.f32.mrb[55].mxu0  ;;  %v1585_v7 = vmax.f32 %v1577_v43, 0.0 }
 0x237   :  { %5342 = vst [vmem:[#allocation54_spill] sm:$0xff] %v4521_v54  ;;  %v1572_v33 = vadd.f32 %v1571_v21, %v4461_v25  ;;  %v1583_v34 = vmax.f32 %v1569_v57, 0.0 }
 0x238   :  { %5343 = vst [vmem:[#allocation63_spill] sm:$0xff] %v4524_v62  ;;  %v1586_v28 = vmax.f32 %v1580_v63, 0.0  ;;  %v3399_v63 = vld [vmem:[%s5091_s0] sm:$0xff]  }
 0x239   :  { %v1584_v15 = vmax.f32 %v1572_v33, 0.0  ;;  %v4545_v21 = vunpack.c.l.bf16 %v3399_v63  ;;  %v4547_v33 = vunpack.c.h.bf16 %v3399_v63 }
 0x23a   :  { %v4527_v10 = vpack.c.bf16 %v1586_v28, %v1585_v7  ;;  %v3400_v7 = vld [vmem:[%s5091_s0 + $0x10] sm:$0xff]  }
 0x23b   :  { %v4529_v23 = vpack.c.bf16 %v1584_v15, %v1583_v34  ;;  %v4552_v28 = vunpack.c.l.bf16 %v3400_v7  ;;  %v4555_v15 = vunpack.c.h.bf16 %v3400_v7 }
 0x23c   :  { %5344 = vst [vmem:[#allocation6_spill] sm:$0xff] %v4527_v10 }
 0x23d   :  { %5345 = vst [vmem:[#allocation8_spill] sm:$0xff] %v4529_v23 }
 0x23e   :  { %v3122_v56 = vpop.f32.mrb[48].mxu1 }
 0x23f   :  { %v1662_v35 = vadd.f32 %v3122_v56, %v4463_v52  ;;  %v1653_v1 = vpop.f32.mrb[49].mxu1  ;;  %v3401_v56 = vld [vmem:[%s5091_s0 + $0x8] sm:$0xff]  }
 0x240   :  { %v1654_v2 = vadd.f32 %v1653_v1, %v4459_v26  ;;  %v3123_v53 = vpop.f32.mrb[50].mxu1 }
 0x241   :  { %v1665_v48 = vadd.f32 %v3123_v53, %v4465_v27  ;;  %v1656_v19 = vpop.f32.mrb[51].mxu1  ;;  %v1670_v37 = vmax.f32 %v1662_v35, 0.0  ;;  %v4560_v35 = vunpack.c.l.bf16 %v3401_v56  ;;  %v4562_v53 = vunpack.c.h.bf16 %v3401_v56 }
 0x242   :  { %v1657_v39 = vadd.f32 %v1656_v19, %v4461_v25  ;;  %v1668_v11 = vmax.f32 %v1654_v2, 0.0 }
 0x243   :  { %v3134_v6 = vpop.f32.mrb[56].mxu0  ;;  %v1671_v32 = vmax.f32 %v1665_v48, 0.0  ;;  %v3402_v48 = vld [vmem:[%s5091_s0 + $0x18] sm:$0xff]  }
 0x244   :  { %v1747_v47 = vadd.f32 %v3134_v6, %v4463_v52  ;;  %v1738_v44 = vpop.f32.mrb[57].mxu0  ;;  %v1669_v58 = vmax.f32 %v1657_v39, 0.0  ;;  %v4567_v19 = vunpack.c.l.bf16 %v3402_v48  ;;  %v4569_v6 = vunpack.c.h.bf16 %v3402_v48 }
 0x245   :  { %v1739_v43 = vadd.f32 %v1738_v44, %v4459_v26  ;;  %v4537_v45 = vpack.c.bf16 %v1671_v32, %v1670_v37  ;;  %v3135_v4 = vpop.f32.mrb[58].mxu0  ;;  %v3403_v32 = vld [vmem:[%s5091_s0 + $0x20] sm:$0xff]  }
 0x246   :  { %v1750_v51 = vadd.f32 %v3135_v4, %v4465_v27  ;;  %v4540_v57 = vpack.c.bf16 %v1669_v58, %v1668_v11  ;;  %v1741_v36 = vpop.f32.mrb[59].mxu0  ;;  %v1755_v1 = vmax.f32 %v1747_v47, 0.0  ;;  %v4574_v11 = vunpack.c.l.bf16 %v3403_v32  ;;  %v3404_v58 = vld [vmem:[%s5091_s0 + $0x28] sm:$0xff]  }
 0x247   :  { %5346 = vst [vmem:[#allocation46_spill] sm:$0xff] %v4537_v45  ;;  %v1742_v34 = vadd.f32 %v1741_v36, %v4461_v25  ;;  %v1753_v39 = vmax.f32 %v1739_v43, 0.0  ;;  %v4576_v47 = vunpack.c.h.bf16 %v3403_v32  ;;  %v4583_v4 = vunpack.c.l.bf16 %v3404_v58  ;;  %v3405_v43 = vld [vmem:[%s5091_s0 + $0x50] sm:$0xff]  }
 0x248   :  { %5347 = vst [vmem:[#allocation52_spill] sm:$0xff] %v4540_v57  ;;  %v1756_v2 = vmax.f32 %v1750_v51, 0.0  ;;  %v4588_v51 = vunpack.c.l.bf16 %v3405_v43  ;;  %v4590_v36 = vunpack.c.h.bf16 %v3405_v43  ;;  %v4594_v7 = vunpack.c.h.bf16 %v3404_v58  ;;  %v3409_v43 = vld [vmem:[%s5091_s0 + $0x40] sm:$0xff]  }
 0x249   :  { %v1754_v37 = vmax.f32 %v1742_v34, 0.0  ;;  %v3406_v34 = vld [vmem:[%s5091_s0 + $0x30] sm:$0xff]   ;;  %v995_v18 = vmul.f32 %v4569_v6, %v4562_v53  ;;  %v1419_v13 = vmul.f32 %v4583_v4, %v4567_v19 }
 0x24a   :  { %v4578_v44 = vpack.c.bf16 %v1756_v2, %v1755_v1  ;;  %v4599_v56 = vunpack.c.l.bf16 %v3406_v34  ;;  %v3407_v1 = vld [vmem:[%s5091_s0 + $0x58] sm:$0xff]   ;;  %v4608_v32 = vunpack.c.h.bf16 %v3406_v34  ;;  %v3410_v34 = vld [vmem:[%s5091_s0 + $0x48] sm:$0xff]   ;;  %v1332_v10 = vmul.f32 %v4588_v51, %v4545_v21 }
 0x24b   :  { %v4592_v63 = vpack.c.bf16 %v1754_v37, %v1753_v39  ;;  %v4604_v2 = vunpack.c.l.bf16 %v3407_v1  ;;  %v4606_v48 = vunpack.c.h.bf16 %v3407_v1  ;;  %v3408_v39 = vld [vmem:[%s5091_s0 + $0x38] sm:$0xff]   ;;  %v4627_v1 = vunpack.c.l.bf16 %v3410_v34 }
 0x24c   :  { %5348 = vst [vmem:[#allocation5_spill] sm:$0xff] %v4578_v44  ;;  %v4613_v37 = vunpack.c.l.bf16 %v3408_v39  ;;  %v4615_v58 = vunpack.c.h.bf16 %v3408_v39  ;;  %v4620_v44 = vunpack.c.l.bf16 %v3409_v43  ;;  %v4629_v45 = vunpack.c.h.bf16 %v3410_v34 }
 0x24d   :  { %5349 = vst [vmem:[#allocation7_spill] sm:$0xff] %v4592_v63  ;;  %v4622_v63 = vunpack.c.h.bf16 %v3409_v43  ;;  %v1333_v38 = vmul.f32 %v4590_v36, %v4547_v33  ;;  %v992_v43 = vmul.f32 %v4552_v28, %v4545_v21  ;;  %v993_v34 = vmul.f32 %v4555_v15, %v4547_v33 }
 0x24e   :  { %v3146_v57 = vpop.f32.mrb[52].mxu1  ;;  %v1334_v54 = vmul.f32 %v4604_v2, %v4560_v35 }
 0x24f   :  { %v1832_v39 = vadd.f32 %v3146_v57, %v4463_v52  ;;  %v1823_v22 = vpop.f32.mrb[53].mxu1  ;;  %v1335_v57 = vmul.f32 %v4606_v48, %v4562_v53  ;;  %v3282_v3 = vpack.c.bf16 %v1333_v38, %v1332_v10  ;;  %v3284_v40 = vpack.c.bf16 %v993_v34, %v992_v43 }
 0x250   :  { %v1824_v23 = vadd.f32 %v1823_v22, %v4459_v26  ;;  %v3147_v17 = vpop.f32.mrb[54].mxu1  ;;  %v994_v22 = vmul.f32 %v4567_v19, %v4560_v35  ;;  %v1418_v38 = vmul.f32 %v4576_v47, %v4555_v15 }
 0x251   :  { %v1840_v62 = vmax.f32 %v1832_v39, 0.0  ;;  %v1835_v20 = vadd.f32 %v3147_v17, %v4465_v27  ;;  %v1826_v0 = vpop.f32.mrb[55].mxu1  ;;  %v3286_v24 = vpack.c.bf16 %v1335_v57, %v1334_v54  ;;  %3283 = vmatprep.subr.bf16.mxu0 %v3282_v3  ;;  %v1417_v17 = vmul.f32 %v4574_v11, %v4552_v28 }
 0x252   :  { %v1838_v12 = vmax.f32 %v1824_v23, 0.0  ;;  %v1827_v46 = vadd.f32 %v1826_v0, %v4461_v25  ;;  %3285 = vmatpush3.bf16.msra.mxu0 %v3284_v40  ;;  %v1077_v0 = vmul.f32 %v4574_v11, %v4545_v21  ;;  %v3288_v43 = vpack.c.bf16 %v995_v18, %v994_v22 }
 0x253   :  { %v3158_v42 = vpop.f32.mrb[60].mxu0  ;;  %v1841_v8 = vmax.f32 %v1835_v20, 0.0  ;;  %v1078_v20 = vmul.f32 %v4576_v47, %v4547_v33  ;;  %3287 = vmatprep.subr.bf16.mxu0 %v3286_v24  ;;  %v3290_v34 = vpack.c.bf16 %v1418_v38, %v1417_v17  ;;  %v1079_v18 = vmul.f32 %v4583_v4, %v4560_v35 }
 0x254   :  { %v1917_v10 = vadd.f32 %v3158_v42, %v4463_v52  ;;  %v1908_v49 = vpop.f32.mrb[61].mxu0  ;;  %v1839_v23 = vmax.f32 %v1827_v46, 0.0  ;;  %v1080_v24 = vmul.f32 %v4594_v7, %v4562_v53  ;;  %v1503_v38 = vmul.f32 %v4608_v32, %v4555_v15 }
 0x255   :  { %v1909_v3 = vadd.f32 %v1908_v49, %v4459_v26  ;;  %v4664_v54 = vpack.c.bf16 %v1841_v8, %v1840_v62  ;;  %v3159_v39 = vpop.f32.mrb[62].mxu0  ;;  %v3292_v40 = vpack.c.bf16 %v1078_v20, %v1077_v0  ;;  %v1420_v8 = vmul.f32 %v4594_v7, %v4569_v6 }
 0x256   :  { %v1925_v57 = vmax.f32 %v1917_v10, 0.0  ;;  %v1920_v42 = vadd.f32 %v3159_v39, %v4465_v27  ;;  %v4667_v16 = vpack.c.bf16 %v1839_v23, %v1838_v12  ;;  %v1911_v46 = vpop.f32.mrb[63].mxu0  ;;  %3289 = vmatpush3.bf16.msra.mxu0 %v3288_v43  ;;  %v1502_v12 = vmul.f32 %v4599_v56, %v4552_v28 }
 0x257   :  { %5350 = vst [vmem:[#allocation41_spill] sm:$0xff] %v4664_v54  ;;  %v1923_v30 = vmax.f32 %v1909_v3, 0.0  ;;  %v1912_v14 = vadd.f32 %v1911_v46, %v4461_v25  ;;  %3291 = vmatprep.subr.bf16.mxu0 %v3290_v34  ;;  %v3294_v17 = vpack.c.bf16 %v1420_v8, %v1419_v13  ;;  %v1162_v10 = vmul.f32 %v4599_v56, %v4545_v21 }
 0x258   :  { %v1926_v62 = vmax.f32 %v1920_v42, 0.0  ;;  %v3296_v23 = vpack.c.bf16 %v1080_v24, %v1079_v18  ;;  %v1163_v0 = vmul.f32 %v4608_v32, %v4547_v33  ;;  %v1504_v20 = vmul.f32 %v4613_v37, %v4567_v19 }
 0x259   :  { %v1924_v22 = vmax.f32 %v1912_v14, 0.0  ;;  %v3298_v14 = vpack.c.bf16 %v1503_v38, %v1502_v12  ;;  %v1505_v13 = vmul.f32 %v4615_v58, %v4569_v6  ;;  %v4696_v39 = vmul.f32 %v4613_v37, %v4560_v35 }
 0x25a   :  { %v4684_v49 = vpack.c.bf16 %v1926_v62, %v1925_v57  ;;  %3293 = vmatpush3.bf16.msra.mxu0 %v3292_v40  ;;  %v3300_v43 = vpack.c.bf16 %v1163_v0, %v1162_v10  ;;  %v4700_v34 = vmul.f32 %v4615_v58, %v4562_v53  ;;  %v4704_v57 = vmul.f32 %v4620_v44, %v4552_v28 }
 0x25b   :  { %v4690_v3 = vpack.c.bf16 %v1924_v22, %v1923_v30  ;;  %v4708_v30 = vmul.f32 %v4622_v63, %v4555_v15  ;;  %3295 = vmatprep.subr.bf16.mxu0 %v3294_v17  ;;  %v3302_v42 = vpack.c.bf16 %v1505_v13, %v1504_v20  ;;  %v4712_v46 = vmul.f32 %v4620_v44, %v4545_v21 }
 0x25c   :  { %5351 = vst [vmem:[#allocation50_spill] sm:$0xff] %v4684_v49  ;;  %v4716_v40 = vmul.f32 %v4622_v63, %v4547_v33  ;;  %v4720_v8 = vmul.f32 %v4627_v1, %v4567_v19  ;;  %v3304_v18 = vpack.c.bf16 %v4700_v34, %v4696_v39  ;;  %v4728_v12 = vmul.f32 %v4629_v45, %v4569_v6 }
 0x25d   :  { %5352 = vst [vmem:[#allocation11_spill] sm:$0xff] %v4690_v3  ;;  %v3306_v24 = vpack.c.bf16 %v4708_v30, %v4704_v57  ;;  %v4732_v21 = vmul.f32 %v4627_v1, %v4560_v35  ;;  %v4739_v38 = vmul.f32 %v4629_v45, %v4562_v53  ;;  %v4743_v10 = vmul.f32 %v4588_v51, %v4552_v28 }
 0x25e   :  { %v3170_v62 = vpop.f32.mrb[56].mxu1  ;;  %3297 = vmatpush3.bf16.msra.mxu0 %v3296_v23  ;;  %v4750_v13 = vmul.f32 %v4590_v36, %v4555_v15  ;;  %v4754_v39 = vmul.f32 %v4604_v2, %v4567_v19  ;;  %v4761_v23 = vmul.f32 %v4606_v48, %v4569_v6  ;;  %v4768_v19 = vmul.f32 %v4599_v56, %v4574_v11 }
 0x25f   :  { %v2002_v33 = vadd.f32 %v3170_v62, %v4463_v52  ;;  %v1993_v22 = vpop.f32.mrb[57].mxu1  ;;  %3299 = vmatprep.subr.bf16.mxu0 %v3298_v14  ;;  %v4778_v6 = vmul.f32 %v4613_v37, %v4583_v4  ;;  %v4783_v57 = vmul.f32 %v4615_v58, %v4594_v7 }
 0x260   :  { %v1994_v0 = vadd.f32 %v1993_v22, %v4459_v26  ;;  %v3171_v20 = vpop.f32.mrb[58].mxu1 }
 0x261   :  { %v2010_v53 = vmax.f32 %v2002_v33, 0.0  ;;  %v2005_v34 = vadd.f32 %v3171_v20, %v4465_v27  ;;  %v1996_v28 = vpop.f32.mrb[59].mxu1  ;;  %v4774_v20 = vmul.f32 %v4608_v32, %v4576_v47 }
 0x262   :  { %v2008_v30 = vmax.f32 %v1994_v0, 0.0  ;;  %v1997_v15 = vadd.f32 %v1996_v28, %v4461_v25  ;;  %3301 = vmatpush3.bf16.msra.mxu0 %v3300_v43  ;;  %v4796_v43 = vmul.f32 %v4622_v63, %v4576_v47 }
 0x263   :  { %v3182_v33 = vpop.f32.mrb[64].mxu0  ;;  %v2011_v22 = vmax.f32 %v2005_v34, 0.0  ;;  %v4787_v34 = vmul.f32 %v4620_v44, %v4574_v11  ;;  %3303 = vmatprep.subr.bf16.mxu0 %v3302_v42 }
 0x264   :  { %v2087_v0 = vadd.f32 %v3182_v33, %v4463_v52  ;;  %v2078_v28 = vpop.f32.mrb[65].mxu0  ;;  %v2009_v62 = vmax.f32 %v1997_v15, 0.0 }
 0x265   :  { %v2079_v14 = vadd.f32 %v2078_v28, %v4459_v26  ;;  %v4790_v35 = vpack.c.bf16 %v2011_v22, %v2010_v53  ;;  %v3183_v17 = vpop.f32.mrb[66].mxu0  ;;  %v3324_v53 = vpack.c.bf16 %v4783_v57, %v4778_v6  ;;  %v5370_v57 = vld [vmem:[#allocation32_spill] sm:$0xff]  ;;  %v5371_v6 = vld [vmem:[#allocation65_spill] sm:$0xff] }
 0x266   :  { %v2095_v15 = vmax.f32 %v2087_v0, 0.0  ;;  %v2090_v52 = vadd.f32 %v3183_v17, %v4465_v27  ;;  %v4799_v49 = vpack.c.bf16 %v2009_v62, %v2008_v30  ;;  %v2081_v3 = vpop.f32.mrb[67].mxu0  ;;  %v3190_v54 = vpop.f32.mrb[60].mxu1  ;;  %3305 = vmatpush3.bf16.msra.mxu0 %v3304_v18  ;;  %v4810_v30 = vmul.f32 %v4627_v1, %v4583_v4 }
 0x267   :  { %5353 = vst [vmem:[#allocation14_spill] sm:$0xff] %v4790_v35  ;;  %v2093_v22 = vmax.f32 %v2079_v14, 0.0  ;;  %v2082_v42 = vadd.f32 %v2081_v3, %v4461_v25  ;;  %v2144_v28 = vadd.f32 %v3190_v54, %v3944_v9  ;;  %v2135_v33 = vpop.f32.mrb[61].mxu1  ;;  %v4814_v62 = vmul.f32 %v4629_v45, %v4594_v7  ;;  %3307 = vmatprep.subr.bf16.mxu0 %v3306_v24 }
 0x268   :  { %v2096_v35 = vmax.f32 %v2090_v52, 0.0  ;;  %v2136_v0 = vadd.f32 %v2135_v33, %v3954_v41  ;;  %v3191_v17 = vpop.f32.mrb[62].mxu1  ;;  %v4820_v41 = vmul.f32 %v4588_v51, %v4574_v11  ;;  %v4833_v24 = vmul.f32 %v4590_v36, %v4576_v47 }
 0x269   :  { %v2094_v3 = vmax.f32 %v2082_v42, 0.0  ;;  %v2168_v9 = vadd.f32 %v2144_v28, %v3681_v59  ;;  %v2147_v54 = vadd.f32 %v3191_v17, %v3966_v29  ;;  %v2138_v14 = vpop.f32.mrb[63].mxu1  ;;  %v3330_v26 = vpack.c.bf16 %v4814_v62, %v4810_v30  ;;  %v5377_v30 = vld [vmem:[#allocation54_spill] sm:$0xff]  ;;  %v5378_v62 = vld [vmem:[#allocation4_spill] sm:$0xff] }
 0x26a   :  { %v4822_v52 = vpack.c.bf16 %v2096_v35, %v2095_v15  ;;  %v2166_v18 = vadd.f32 %v2136_v0, %v3663_v50  ;;  %v2139_v33 = vadd.f32 %v2138_v14, %v3976_v55  ;;  %v5354_v50 = vpack.c.bf16 %v4716_v40, %v4712_v46 }
 0x26b   :  { %v4828_v42 = vpack.c.bf16 %v2094_v3, %v2093_v22  ;;  %v2176_v59 = vmax.f32 %v2168_v9, 0.0  ;;  %v2169_v29 = vadd.f32 %v2147_v54, %v3701_v5  ;;  %v4841_v55 = vmul.f32 %v4604_v2, %v4583_v4 }
 0x26c   :  { %v2174_v11 = vmax.f32 %v2166_v18, 0.0  ;;  %v2167_v35 = vadd.f32 %v2139_v33, %v3683_v60  ;;  %3309 = vmatpush3.bf16.msra.mxu0 %v5354_v50  ;;  %v4845_v15 = vmul.f32 %v4606_v48, %v4594_v7  ;;  %v5355_v47 = vpack.c.bf16 %v4728_v12, %v4720_v8 }
 0x26d   :  { %v2177_v5 = vmax.f32 %v2169_v29, 0.0  ;;  %v3333_v60 = vpack.c.bf16 %v4833_v24, %v4820_v41  ;;  %v4854_v46 = vmul.f32 %v4620_v44, %v4599_v56  ;;  %v4858_v4 = vmul.f32 %v4622_v63, %v4608_v32  ;;  %v5379_v41 = vld [vmem:[#allocation8_spill] sm:$0xff]  ;;  %v5380_v24 = vld [vmem:[#allocation71_spill] sm:$0xff] }
 0x26e   :  { %3311 = vmatprep.subr.bf16.mxu0 %v5355_v47  ;;  %v2175_v40 = vmax.f32 %v2167_v35, 0.0  ;;  %v3194_v22 = vpop.f32.mrb[64].mxu1  ;;  %v3336_v7 = vpack.c.bf16 %v4845_v15, %v4841_v55  ;;  %v4864_v8 = vmul.f32 %v4627_v1, %v4613_v37  ;;  %v4868_v12 = vmul.f32 %v4629_v45, %v4615_v58  ;;  %v5359_v47 = vld [vmem:[#allocation31_spill] sm:$0xff]  ;;  %v5381_v55 = vld [vmem:[#allocation6_spill] sm:$0xff] }
 0x26f   :  { %v2160_v28 = vadd.f32 %v3194_v22, %v4031_v61  ;;  %v2151_v0 = vpop.f32.mrb[65].mxu1  ;;  %v2183_v17 = vpack.c.bf16 %v2177_v5, %v2176_v59  ;;  %v3339_v3 = vpack.c.bf16 %v4858_v4, %v4854_v46  ;;  %v4875_v9 = vmul.f32 %v4588_v51, %v4599_v56  ;;  %v2412_v61 = vld [vmem:[%s5097_s7] sm:$0xff]  ;;  %v5357_v56 = vld [vmem:[#allocation35_spill] sm:$0xff]  ;;  %v5383_v46 = vld [vmem:[#allocation52_spill] sm:$0xff] }
 0x270   :  { %v2152_v54 = vadd.f32 %v2151_v0, %v4045_v31  ;;  %v3195_v14 = vpop.f32.mrb[66].mxu1  ;;  %v2182_v18 = vpack.c.bf16 %v2175_v40, %v2174_v11  ;;  %v5356_v33 = vpack.c.bf16 %v4739_v38, %v4732_v21  ;;  %v3342_v59 = vpack.c.bf16 %v4868_v12, %v4864_v8  ;;  %v5358_v31 = vld [vmem:[#allocation70_spill] sm:$0xff]  ;;  %v5385_v8 = vld [vmem:[#allocation7_spill] sm:$0xff]  ;;  %v5386_v12 = vld [vmem:[#allocation5_spill] sm:$0xff] }
 0x271   :  { %v4888_v29 = vmul.f32 %v4590_v36, %v4608_v32  ;;  %v2172_v35 = vadd.f32 %v2160_v28, %v5357_v56  ;;  %v2163_v50 = vadd.f32 %v3195_v14, %v5358_v31  ;;  %v2154_v11 = vpop.f32.mrb[67].mxu1  ;;  %v3413_v5 = vmov 0.0|0.0   ;;  %v5360_v32 = vld [vmem:[#allocation73_spill] sm:$0xff]  ;;  %v5361_v14 = vld [vmem:[#allocation39_spill] sm:$0xff]  ;;  %v5362_v56 = vld [vmem:[#allocation34_spill] sm:$0xff] }
 0x272   :  { %3313 = vmatpush3.bf16.msra.mxu0 %v5356_v33  ;;  %v4895_v21 = vmul.f32 %v4604_v2, %v4613_v37  ;;  %v4899_v38 = vmul.f32 %v4606_v48, %v4615_v58  ;;  %v2170_v40 = vadd.f32 %v2152_v54, %v5359_v47  ;;  %v2155_v22 = vadd.f32 %v2154_v11, %v5360_v32  ;;  %v2417_v37 = vld [vmem:[%s5097_s7 + $0x28] sm:$0x7f]  ;;  %v5382_v15 = vld [vmem:[#allocation10_spill] sm:$0xff] }
 0x273   :  { %3314 = vmatprep.subr.bf16.mxu0 %v3413_v5  ;;  %3196 = vmatprep.subr.bf16.mxu1 %v2182_v18  ;;  %v3345_v28 = vpack.c.bf16 %v4888_v29, %v4875_v9  ;;  %v4907_v0 = vmul.f32 %v4588_v51, %v4620_v44  ;;  %v2173_v33 = vadd.f32 %v2163_v50, %v5361_v14  ;;  %v2416_v51 = vld [vmem:[%s5097_s7 + $0x20] sm:$0x7f]  ;;  %v5388_v9 = vld [vmem:[#allocation11_spill] sm:$0xff] }
 0x274   :  { %3197 = vmatpush3.bf16.msra.mxu1 %v2182_v18  ;;  %v3348_v58 = vpack.c.bf16 %v4899_v38, %v4895_v21  ;;  %v4917_v54 = vmul.f32 %v4590_v36, %v4622_v63  ;;  %v2171_v31 = vadd.f32 %v2155_v22, %v5362_v56  ;;  %v5363_v44 = vpack.c.bf16 %v4750_v13, %v4743_v10  ;;  %v2415_v13 = vld [vmem:[%s5097_s7 + $0x18] sm:$0xff]  ;;  %v5384_v4 = vld [vmem:[#allocation46_spill] sm:$0xff]  ;;  %v2418_v21 = vld [vmem:[%s5097_s7 + $0x30] sm:$0x7f] }
 0x275   :  { %2491 = vmatmul.mubr.f32.vlgmr.msra.gmra.mrb[68].mxu0 %v2412_v61  ;;  %3198 = vmatprep.subr.bf16.mxu1 %v2183_v17  ;;  %v4928_v18 = vmul.f32 %v4604_v2, %v4627_v1  ;;  %v4932_v61 = vmul.f32 %v4606_v48, %v4629_v45  ;;  %v2180_v36 = vmax.f32 %v2172_v35, 0.0  ;;  %v2181_v63 = vmax.f32 %v2173_v33, 0.0  ;;  %v5390_v29 = vld [vmem:[#allocation14_spill] sm:$0xff]  ;;  %v5391_v33 = vld [vmem:[#allocation37_spill] sm:$0xff] }
 0x276   :  { %3316 = vmatpush1.bf16.msra.mxu0 %v5363_v44  ;;  %v3351_v10 = vpack.c.bf16 %v4917_v54, %v4907_v0  ;;  %2495 = vmatprep.mubr.f32.mxu0 %v2417_v37  ;;  %v2178_v50 = vmax.f32 %v2170_v40, 0.0  ;;  %v2179_v2 = vmax.f32 %v2171_v31, 0.0  ;;  %v5364_v35 = vpack.c.bf16 %v4761_v23, %v4754_v39  ;;  %v2244_v39 = vld [vmem:[%s5098_s6 + $0x8] sm:$0xff]  ;;  %v5373_v40 = vld [vmem:[#allocation57_spill] sm:$0xff] }
 0x277   :  { %3317 = vmatprep.subr.bf16.mxu0 %v3413_v5  ;;  %v3354_v1 = vpack.c.bf16 %v4932_v61, %v4928_v18  ;;  %v2185_v45 = vpack.c.bf16 %v2181_v63, %v2180_v36  ;;  %v5365_v11 = vpack.c.bf16 %v4774_v20, %v4768_v19  ;;  %v3411_v23 = vld [vmem:[%s5096_s4 + $0x8] sm:$0xff]   ;;  %v5367_v19 = vld [vmem:[#allocation40_spill] sm:$0xff]  ;;  %v5369_v47 = vpack.c.bf16 %v4796_v43, %v4787_v34  ;;  %v5392_v56 = vld [vmem:[#allocation33_spill] sm:$0xff] }
 0x278   :  { %3199 = vmatpush3.bf16.msra.mxu1 %v2183_v17  ;;  %v2184_v48 = vpack.c.bf16 %v2179_v2, %v2178_v50  ;;  %v5366_v17 = vld [vmem:[#allocation12_spill] sm:$0xff]  ;;  %v5368_v20 = vld [vmem:[#allocation59_spill] sm:$0xff] }
 0x279   :  { %2496 = vmatmul.mubr.f32.gmra.mrb[70].mxu0 %v2416_v51  ;;  %v5374_v34 = vld [vmem:[#allocation36_spill] sm:$0xff]  ;;  %v5375_v43 = vld [vmem:[#allocation63_spill] sm:$0xff] }
 0x27a   :  { %3319 = vmatpush1.bf16.msra.mxu0 %v5364_v35  ;;  %2680 = vmatprep.mubr.msk.f32.mxu0 %vm2251_vm2, %v2415_v13 }
 0x27b   :  { %3320 = vmatprep.subr.bf16.mxu0 %v3413_v5  ;;  %3200 = vmatprep.subr.bf16.mxu1 %v2184_v48 }
 0x27c   :  { %3201 = vmatpush3.bf16.msra.mxu1 %v2184_v48 }
 0x27d   :  { %3202 = vmatprep.subr.bf16.mxu1 %v2185_v45 }
 0x27e   :  { %3322 = vmatpush1.bf16.msra.mxu0 %v5365_v11 }
 0x27f   :  { %3323 = vmatprep.subr.bf16.mxu0 %v3413_v5 }
 0x280   :  { %3203 = vmatpush3.bf16.msra.mxu1 %v2185_v45 }
 0x281   :  { %3209 = vmatprep.subr.bf16.mxu1 %v5366_v17 }
 0x282   :  { %3325 = vmatpush1.bf16.msra.mxu0 %v3324_v53  ;;  %v5372_v53 = vld [vmem:[#allocation38_spill] sm:$0xff] }
 0x283   :  { %3326 = vmatprep.subr.bf16.mxu0 %v3413_v5  ;;  %3205 = vmatmul.mubr.msk.bf16.vlgmr.msra.gmra.mrb[68].mxu1 %vm932_vm1, %v3411_v23 }
 0x284   :  { %3211 = vmatpush3.bf16.msra.mxu1 %v5367_v19  ;;  %2322 = vmatprep.mubr.f32.mxu1 %v2244_v39 }
 0x285   :  { %3213 = vmatprep.subr.bf16.mxu1 %v5368_v20 }
 0x286   :  { %3328 = vmatpush1.bf16.msra.mxu0 %v5369_v47 }
 0x287   :  { %3329 = vmatprep.subr.bf16.mxu0 %v3413_v5 }
 0x288   :  { %3215 = vmatpush3.bf16.msra.mxu1 %v5370_v57 }
 0x289   :  { %3217 = vmatprep.subr.bf16.mxu1 %v5371_v6 }
 0x28a   :  { %3331 = vmatpush1.bf16.msra.mxu0 %v3330_v26  ;;  %v5376_v26 = vld [vmem:[#allocation47_spill] sm:$0xff] }
 0x28b   :  { %3332 = vmatprep.subr.bf16.mxu0 %v3413_v5 }
 0x28c   :  { %3219 = vmatpush3.bf16.msra.mxu1 %v5372_v53 }
 0x28d   :  { %3221 = vmatprep.subr.bf16.mxu1 %v5373_v40 }
 0x28e   :  { %3334 = vmatpush1.bf16.msra.mxu0 %v3333_v60  ;;  %v2243_v60 = vld [vmem:[%s5098_s6] sm:$0xff] }
 0x28f   :  { %3335 = vmatprep.subr.bf16.mxu0 %v3413_v5 }
 0x290   :  { %3223 = vmatpush3.bf16.msra.mxu1 %v5374_v34 }
 0x291   :  { %3225 = vmatprep.subr.bf16.mxu1 %v5375_v43 }
 0x292   :  { %3337 = vmatpush1.bf16.msra.mxu0 %v3336_v7  ;;  %v2414_v7 = vld [vmem:[%s5097_s7 + $0x10] sm:$0xff] }
 0x293   :  { %3338 = vmatprep.subr.bf16.mxu0 %v3413_v5 }
 0x294   :  { %3227 = vmatpush3.bf16.msra.mxu1 %v5376_v26 }
 0x295   :  { %3229 = vmatprep.subr.bf16.mxu1 %v5377_v30 }
 0x296   :  { %3340 = vmatpush1.bf16.msra.mxu0 %v3339_v3  ;;  %v5387_v3 = vld [vmem:[#allocation41_spill] sm:$0xff] }
 0x297   :  { %3341 = vmatprep.subr.bf16.mxu0 %v3413_v5 }
 0x298   :  { %3231 = vmatpush3.bf16.msra.mxu1 %v5378_v62 }
 0x299   :  { %3233 = vmatprep.subr.bf16.mxu1 %v5379_v41 }
 0x29a   :  { %3343 = vmatpush1.bf16.msra.mxu0 %v3342_v59  ;;  %v5389_v59 = vld [vmem:[#allocation50_spill] sm:$0xff] }
 0x29b   :  { %3344 = vmatprep.subr.bf16.mxu0 %v3413_v5 }
 0x29c   :  { %3235 = vmatpush3.bf16.msra.mxu1 %v5380_v24 }
 0x29d   :  { %3237 = vmatprep.subr.bf16.mxu1 %v5381_v55 }
 0x29e   :  { %3346 = vmatpush1.bf16.msra.mxu0 %v3345_v28 }
 0x29f   :  { %3347 = vmatprep.subr.bf16.mxu0 %v3413_v5 }
 0x2a0   :  { %3239 = vmatpush3.bf16.msra.mxu1 %v5382_v15 }
 0x2a1   :  { %3240 = vmatprep.subr.bf16.mxu1 %v3413_v5 }
 0x2a2   :  { %3349 = vmatpush1.bf16.msra.mxu0 %v3348_v58 }
 0x2a3   :  { %3350 = vmatprep.subr.bf16.mxu0 %v3413_v5  ;;  %2323 = vmatmul.mubr.f32.vlgmr.msra.gmra.mrb[72].mxu1 %v2243_v60 }
 0x2a4   :  { %3242 = vmatpush1.bf16.msra.mxu1 %v5383_v46 }
 0x2a5   :  { %3243 = vmatprep.subr.bf16.mxu1 %v3413_v5 }
 0x2a6   :  { %3352 = vmatpush1.bf16.msra.mxu0 %v3351_v10 }
 0x2a7   :  { %3353 = vmatprep.subr.bf16.mxu0 %v3413_v5 }
 0x2a8   :  { %3245 = vmatpush1.bf16.msra.mxu1 %v5384_v4 }
 0x2a9   :  { %3246 = vmatprep.subr.bf16.mxu1 %v3413_v5 }
 0x2aa   :  { %3355 = vmatpush1.bf16.msra.mxu0 %v3354_v1  ;;  %v2245_v1 = vld [vmem:[%s5098_s6 + $0x10] sm:$0xff] }
 0x2ac   :  { %3248 = vmatpush1.bf16.msra.mxu1 %v5385_v8 }
 0x2ad   :  { %2566 = vmatmul.mubr.f32.vlgmr.msra.gmra.mrb[72].mxu0 %v2414_v7  ;;  %3249 = vmatprep.subr.bf16.mxu1 %v3413_v5 }
 0x2b0   :  { %3251 = vmatpush1.bf16.msra.mxu1 %v5386_v12 }
 0x2b1   :  { %3252 = vmatprep.subr.bf16.mxu1 %v3413_v5 }
 0x2b4   :  { %3254 = vmatpush1.bf16.msra.mxu1 %v4667_v16  ;;  %v2248_v16 = vld [vmem:[%s5098_s6 + $0x28] sm:$0x7f] }
 0x2b5   :  { %3255 = vmatprep.subr.bf16.mxu1 %v3413_v5  ;;  %2327 = vmatprep.mubr.f32.mxu1 %v2248_v16 }
 0x2b8   :  { %3257 = vmatpush1.bf16.msra.mxu1 %v5387_v3 }
 0x2b9   :  { %3258 = vmatprep.subr.bf16.mxu1 %v3413_v5 }
 0x2bc   :  { %3260 = vmatpush1.bf16.msra.mxu1 %v5388_v9 }
 0x2bd   :  { %3261 = vmatprep.subr.bf16.mxu1 %v3413_v5 }
 0x2c0   :  { %3263 = vmatpush1.bf16.msra.mxu1 %v5389_v59 }
 0x2c1   :  { %3264 = vmatprep.subr.bf16.mxu1 %v3413_v5 }
 0x2c4   :  { %3266 = vmatpush1.bf16.msra.mxu1 %v4799_v49  ;;  %v2247_v49 = vld [vmem:[%s5098_s6 + $0x20] sm:$0x7f] }
 0x2c5   :  { %3267 = vmatprep.subr.bf16.mxu1 %v3413_v5  ;;  %2328 = vmatmul.mubr.f32.gmra.mrb[74].mxu1 %v2247_v49 }
 0x2c8   :  { %3269 = vmatpush1.bf16.msra.mxu1 %v5390_v29 }
 0x2c9   :  { %3270 = vmatprep.subr.bf16.mxu1 %v3413_v5 }
 0x2cc   :  { %3272 = vmatpush1.bf16.msra.mxu1 %v4828_v42  ;;  %v2419_v42 = vld [vmem:[%s5097_s7 + $0x38] sm:$0x7f] }
 0x2cd   :  { %3273 = vmatprep.subr.bf16.mxu1 %v3413_v5  ;;  %2681 = vmatprep.mubr.msk.f32.mxu0 %vm2251_vm2, %v2419_v42 }
 0x2ce   :  { %2571 = vmatmul.mubr.f32.gmra.mrb[74].mxu0 %v2418_v21 }
 0x2d0   :  { %3275 = vmatpush1.bf16.msra.mxu1 %v4822_v52  ;;  %v2246_v52 = vld [vmem:[%s5098_s6 + $0x18] sm:$0xff] }
 0x2d1   :  { %3276 = vmatprep.subr.bf16.mxu1 %v3413_v5  ;;  %2678 = vmatprep.mubr.msk.f32.mxu1 %vm2251_vm2, %v2246_v52 }
 0x348   :  { %v2902_v38 = vpop.f32.mrb[68].mxu0 }
 0x349   :  { %v2903_v32 = vpop.f32.mrb[69].mxu0 }
 0x34a   :  { %v2904_v22 = vadd.f32 %v2903_v32, %v2902_v38 }
 0x34c   :  { %v2905_v28 = vpop.f32.mrb[70].mxu0 }
 0x34d   :  { %v2906_v0 = vpop.f32.mrb[71].mxu0 }
 0x34e   :  { %v2907_v37 = vadd.f32 %v2906_v0, %v2905_v28 }
 0x356   :  { %v3206_v14 = vpop.f32.mrb[68].mxu1 }
 0x357   :  { %v2229_v58 = vadd.f32 %v3206_v14, %v5391_v33  ;;  %v2220_v54 = vpop.f32.mrb[69].mxu1 }
 0x358   :  { %v2221_v31 = vadd.f32 %v2220_v54, %v5392_v56  ;;  %v3207_v44 = vpop.f32.mrb[70].mxu1 }
 0x359   :  { %v2232_v51 = vadd.f32 %v3207_v44, %v4465_v27  ;;  %v2223_v18 = vpop.f32.mrb[71].mxu1  ;;  %v2237_v36 = vmax.f32 %v2229_v58, 0.0  ;;  %v2250_v27 = vld [vmem:[%s5098_s6 + $0x38] sm:$0x7f] }
 0x35a   :  { %v2224_v61 = vadd.f32 %v2223_v18, %v4461_v25  ;;  %v2235_v10 = vmax.f32 %v2221_v31, 0.0  ;;  %v2249_v25 = vld [vmem:[%s5098_s6 + $0x30] sm:$0x7f] }
 0x35b   :  { %v2238_v63 = vmax.f32 %v2232_v51, 0.0 }
 0x35c   :  { %v2236_v13 = vmax.f32 %v2224_v61, 0.0 }
 0x35d   :  { %v3280_v50 = vpack.c.bf16 %v2238_v63, %v2237_v36 }
 0x35e   :  { %v3277_v2 = vpack.c.bf16 %v2236_v13, %v2235_v10 }
 0x360   :  { %3278 = vmatpush1.bf16.msra.mxu1 %v3277_v2 }
 0x361   :  { %3279 = vmatprep.subr.bf16.mxu1 %v3413_v5 }
 0x364   :  { %3281 = vmatpush1.bf16.msra.mxu1 %v3280_v50 }
 0x367   :  { %2398 = vmatmul.mubr.f32.vlgmr.msra.gmra.mrb[76].mxu1 %v2245_v1 }
 0x368   :  { %2679 = vmatprep.mubr.msk.f32.mxu1 %vm2251_vm2, %v2250_v27 }
 0x36b   :  { %2403 = vmatmul.mubr.f32.gmra.mrb[78].mxu1 %v2249_v25 }
 0x376   :  { %v2864_v45 = vpop.f32.mrb[72].mxu1 }
 0x377   :  { %v2865_v48 = vpop.f32.mrb[73].mxu1 }
 0x378   :  { %v2866_v5 = vadd.f32 %v2865_v48, %v2864_v45 }
 0x380   :  { %v2567_v35 = vpop.f32.mrb[72].mxu0 }
 0x381   :  { %v2568_v11 = vadd.f32 %v2904_v22, %v2567_v35  ;;  %v2569_v17 = vpop.f32.mrb[73].mxu0 }
 0x383   :  { %2576 = vst.msk [vmem:[%s5099_s9] sm:$0xff] %vm2408_vm3, %v2568_v11 }
 0x398   :  { %v2867_v39 = vpop.f32.mrb[74].mxu1 }
 0x399   :  { %v2868_v23 = vpop.f32.mrb[75].mxu1 }
 0x39a   :  { %v2869_v19 = vadd.f32 %v2868_v23, %v2867_v39 }
 0x3a1   :  { %v2572_v20 = vpop.f32.mrb[74].mxu0 }
 0x3a2   :  { %v2573_v47 = vadd.f32 %v2907_v37, %v2572_v20  ;;  %v2574_v57 = vpop.f32.mrb[75].mxu0 }
 0x3a4   :  { %2577 = vst.msk [vmem:[%s5099_s9 + $0x8] sm:$0x7f] %vm2410_vm4, %v2573_v47 }
 0x43a   :  { %v2399_v6 = vpop.f32.mrb[76].mxu1 }
 0x43b   :  { %v2400_v53 = vadd.f32 %v2866_v5, %v2399_v6  ;;  %v2401_v40 = vpop.f32.mrb[77].mxu1 }
 0x43d   :  { %2409 = vst.msk [vmem:[%s5100_s8] sm:$0xff] %vm2408_vm3, %v2400_v53 }
 0x43e   :  { %v2404_v34 = vpop.f32.mrb[78].mxu1 }
 0x43f   :  { %v2405_v43 = vadd.f32 %v2869_v19, %v2404_v34  ;;  %v2406_v26 = vpop.f32.mrb[79].mxu1 }
 0x441   :  { %2411 = vst.msk [vmem:[%s5100_s8 + $0x8] sm:$0x7f] %vm2410_vm4, %v2405_v43 }

</bundles_post_ra>
